<compile_context>
chip_gen: v5e
topology: v5e:2x2
jax: 0.10.0
libtpu: 0.0.40
codegen_flags: <defaults>
</compile_context>

<pallas_src>
import functools

import jax
import jax.numpy as jnp
from jax.experimental import pallas as pl
from jax.experimental.pallas import tpu as pltpu


def _ddpm_loss_kernel(x_ref, eps_ref, nl_ref, sig_ref,
                      w1_ref, b1_ref, temb_ref, w2_ref, b2_ref,
                      partial_ref, *, loss_type):
    # --- load activations (streamed bf16 -> f32 for the elementwise path) ---
    x = x_ref[...].astype(jnp.float32)       # (BM, L)
    eps = eps_ref[...].astype(jnp.float32)   # (BM, L)  (kept f32 for the loss)
    nl = nl_ref[...]                          # (BM, 1) f32
    sig = sig_ref[...]                        # (BM, 1) f32 = sqrt(1 - nl^2), hoisted

    # --- forward diffusion (elementwise, f32 VPU) ---
    y_noisy = nl * x + sig * eps

    # --- noise-reconstruction model: 2-layer MLP w/ noise-level embedding ---
    # bf16 MXU matmuls with f32 accumulation; epilogue stays f32.
    h = jnp.dot(y_noisy.astype(jnp.bfloat16), w1_ref[...],
                preferred_element_type=jnp.float32)
    h = h + b1_ref[...] + nl * temb_ref[...]          # (1,H) and (BM,1)*(1,H) broadcasts
    h = jnp.maximum(h, 0.0)
    eps_recon = jnp.dot(h.astype(jnp.bfloat16), w2_ref[...],
                        preferred_element_type=jnp.float32)
    eps_recon = eps_recon + b2_ref[...]

    # --- loss partial reduction: (BM, L) -> (8, L), pure VPU (vreg-group adds) ---
    diff = eps_recon - eps
    if loss_type == 'l1':
        err = jnp.abs(diff)
    else:  # 'l2' / mse
        err = diff * diff
    bm, l = err.shape
    partial_ref[...] = jnp.sum(err.reshape(bm // 8, 8, l), axis=0)


def ddpm1d_loss(x, eps, noise_level, params, loss_type='l1', bm=None):
    """Fused DDPM1d forward loss. Batch-tiled; per-tile partial sums -> wrapper sum."""
    w1, b1, temb, w2, b2 = params
    B, L = x.shape
    H = w1.shape[1]

    if bm is None:
        bm = min(B, 1024)                # large tiles: amortize per-step overhead
    bm = min(bm, B)
    assert B % bm == 0 and bm % 8 == 0, "demo wrapper requires B % bm == 0, bm % 8 == 0"
    num_tiles = B // bm

    # Stream x / eps as bf16 (halves the dominant HBM traffic); upcast in-kernel.
    x_bf16 = x.astype(jnp.bfloat16)
    eps_bf16 = eps.astype(jnp.bfloat16)

    # Hoist sigma = sqrt(1 - nl^2) out of the kernel (clamped for robustness).
    nl = noise_level.astype(jnp.float32)
    sigma = jnp.sqrt(jnp.maximum(1.0 - nl * nl, 0.0))

    # Activations stream one batch tile per grid step.
    act_spec = pl.BlockSpec((bm, L), lambda i: (i, 0))
    vec_spec = pl.BlockSpec((bm, 1), lambda i: (i, 0))
    # Weights use a constant block index -> fetched into VMEM once, stay resident.
    w1_spec = pl.BlockSpec((L, H), lambda i: (0, 0))
    b1_spec = pl.BlockSpec((1, H), lambda i: (0, 0))
    temb_spec = pl.BlockSpec((1, H), lambda i: (0, 0))
    w2_spec = pl.BlockSpec((H, L), lambda i: (0, 0))
    b2_spec = pl.BlockSpec((1, L), lambda i: (0, 0))
    # Lane-dense per-tile partial sums: one (8, L) block per batch tile.
    out_spec = pl.BlockSpec((8, L), lambda i: (i, 0))

    flops = 2 * B * (L * H + H * L)
    bytes_accessed = (
        (x_bf16.size + eps_bf16.size) * 2              # bf16 activations
        + (nl.size + sigma.size) * 4                   # f32 noise level / sigma
        + (w1.size + w2.size) * 2                      # bf16 weights (fetched once)
        + (b1.size + temb.size + b2.size) * 4          # f32 biases / embedding
        + num_tiles * 8 * L * 4                        # f32 partial sums out
    )

    partials = pl.pallas_call(
        functools.partial(_ddpm_loss_kernel, loss_type=loss_type),
        out_shape=jax.ShapeDtypeStruct((num_tiles * 8, L), jnp.float32),
        grid=(num_tiles,),
        in_specs=[act_spec, act_spec, vec_spec, vec_spec,
                  w1_spec, b1_spec, temb_spec, w2_spec, b2_spec],
        out_specs=out_spec,
        compiler_params=pltpu.CompilerParams(
            # No cross-step dependency -> batch tiles shard across TCs (v7x).
            dimension_semantics=("parallel",)),
        cost_estimate=pl.CostEstimate(
            flops=flops, transcendentals=0, bytes_accessed=bytes_accessed),
    )(x_bf16, eps_bf16, nl, sigma, w1, b1, temb, w2, b2)

    return jnp.sum(partials) * (1.0 / (B * L))


def ddpm1d_loss_ref(x, eps, noise_level, params, loss_type='l1'):
    """Pure-f32 JAX reference of the same forward pass (for tolerance validation)."""
    w1, b1, temb, w2, b2 = params
    nl = noise_level.astype(jnp.float32)
    sig = jnp.sqrt(jnp.maximum(1.0 - nl * nl, 0.0))
    y = nl * x + sig * eps
    h = y @ w1.astype(jnp.float32) + b1 + nl * temb
    h = jnp.maximum(h, 0.0)
    eps_recon = h @ w2.astype(jnp.float32) + b2
    diff = eps_recon - eps
    return jnp.mean(jnp.abs(diff)) if loss_type == 'l1' else jnp.mean(diff * diff)


def make_diffusion_schedule(n_steps):
    """Mirrors the PyTorch __init__ schedule precomputation (host-side glue)."""
    betas = jnp.linspace(1e-4, 0.02, n_steps, dtype=jnp.float32)
    alphas = 1.0 - betas
    alphas_prod = jnp.cumprod(alphas, 0)
    alphas_prod_p = jnp.concatenate([jnp.ones((1,), jnp.float32), alphas_prod[:-1]], 0)
    return jnp.sqrt(alphas_prod_p)


def sample_continuous_noise_level(key, alphas_prod_p_sqrt, n_steps, batch_size):
    """noise_level ~ U(sqrt(a_bar[t-1]), sqrt(a_bar[t])), t ~ U{1..n_steps-1}; shape (B,1)."""
    k_t, k_u = jax.random.split(key)
    t = jax.random.randint(k_t, (batch_size,), 1, n_steps)
    lo = alphas_prod_p_sqrt[t - 1]
    hi = alphas_prod_p_sqrt[t]
    u = jax.random.uniform(k_u, (batch_size,), dtype=jnp.float32)
    nl = lo + u * (hi - lo)
    return nl[:, None]


def init_model_params(key, L, H):
    """Deterministic synthetic denoiser parameters (weights pre-cast to bf16 for the MXU)."""
    k1, k2, k3 = jax.random.split(key, 3)
    w1 = (jax.random.normal(k1, (L, H), jnp.float32) * (1.0 / jnp.sqrt(L))).astype(jnp.bfloat16)
    b1 = jnp.zeros((1, H), jnp.float32)
    temb = jax.random.normal(k3, (1, H), jnp.float32) * 0.1
    w2 = (jax.random.normal(k2, (H, L), jnp.float32) * (1.0 / jnp.sqrt(H))).astype(jnp.bfloat16)
    b2 = jnp.zeros((1, L), jnp.float32)
    return (w1, b1, temb, w2, b2)


if __name__ == "__main__":
    # Modest demo shapes; BM=256 so the grid still has >1 step and exercises the
    # per-tile partial-sum path.  The wrapper default tile is min(B, 1024).
    B, L, H = 512, 128, 256          # batch, 1-D signal length, model hidden width
    BM = 256
    n_steps = 50

    key = jax.random.PRNGKey(0)
    k_x, k_eps, k_nl, k_params = jax.random.split(key, 4)

    x = jax.random.normal(k_x, (B, L), jnp.float32)
    eps = jax.random.normal(k_eps, (B, L), jnp.float32)   # torch.randn_like(x)

    alphas_prod_p_sqrt = make_diffusion_schedule(n_steps)
    noise_level = sample_continuous_noise_level(k_nl, alphas_prod_p_sqrt, n_steps, B)

    params = init_model_params(k_params, L, H)

    loss = ddpm1d_loss(x, eps, noise_level, params, loss_type='l1', bm=BM)
    loss = jax.block_until_ready(loss)

    # sanity: finite scalar, close to the pure-f32 reference (bf16 tolerance)
    loss_ref = jax.block_until_ready(ddpm1d_loss_ref(x, eps, noise_level, params, 'l1'))
    assert loss.shape == () and bool(jnp.isfinite(loss))
    assert bool(jnp.allclose(loss, loss_ref, rtol=5e-2, atol=1e-3)), (loss, loss_ref)

    print("KERNEL_OK")
</pallas_src>

<mosaic_0001>
module attributes {stable_mosaic.version = 11 : i64} {
  func.func @_ddpm_loss_kernel(%arg0: i32, %arg1: memref<256x128xbf16, #tpu.memory_space<vmem>>, %arg2: memref<256x128xbf16, #tpu.memory_space<vmem>>, %arg3: memref<256x1xf32, #tpu.memory_space<vmem>>, %arg4: memref<256x1xf32, #tpu.memory_space<vmem>>, %arg5: memref<128x256xbf16, #tpu.memory_space<vmem>>, %arg6: memref<1x256xf32, #tpu.memory_space<vmem>>, %arg7: memref<1x256xf32, #tpu.memory_space<vmem>>, %arg8: memref<256x128xbf16, #tpu.memory_space<vmem>>, %arg9: memref<1x128xf32, #tpu.memory_space<vmem>>, %arg10: memref<8x128xf32, #tpu.memory_space<vmem>>) attributes {dimension_semantics = [#tpu.dimension_semantics<parallel>], iteration_bounds = array<i64: 2>, scalar_prefetch = 0 : i64, scratch_operands = 0 : i64, tpu.core_type = #tpu.core_type<tc>, window_params = [{transform_indices = @transform_0, window_bounds = array<i64: 256, 128>}, {transform_indices = @transform_1, window_bounds = array<i64: 256, 128>}, {transform_indices = @transform_2, window_bounds = array<i64: 256, 1>}, {transform_indices = @transform_3, window_bounds = array<i64: 256, 1>}, {pipeline_mode = #tpu.pipeline_mode<synchronous>, transform_indices = @transform_4, window_bounds = array<i64: 128, 256>}, {pipeline_mode = #tpu.pipeline_mode<synchronous>, transform_indices = @transform_5, window_bounds = array<i64: 1, 256>}, {pipeline_mode = #tpu.pipeline_mode<synchronous>, transform_indices = @transform_6, window_bounds = array<i64: 1, 256>}, {pipeline_mode = #tpu.pipeline_mode<synchronous>, transform_indices = @transform_7, window_bounds = array<i64: 256, 128>}, {pipeline_mode = #tpu.pipeline_mode<synchronous>, transform_indices = @transform_8, window_bounds = array<i64: 1, 128>}, {transform_indices = @transform_9, window_bounds = array<i64: 8, 128>}]} {
    %c0 = arith.constant 0 : index
    %c0_0 = arith.constant 0 : index
    %0 = vector.load %arg1[%c0, %c0_0] : memref<256x128xbf16, #tpu.memory_space<vmem>>, vector<256x128xbf16>
    %1 = arith.extf %0 : vector<256x128xbf16> to vector<256x128xf32>
    %c0_1 = arith.constant 0 : index
    %c0_2 = arith.constant 0 : index
    %2 = vector.load %arg2[%c0_1, %c0_2] : memref<256x128xbf16, #tpu.memory_space<vmem>>, vector<256x128xbf16>
    %3 = arith.extf %2 : vector<256x128xbf16> to vector<256x128xf32>
    %c0_3 = arith.constant 0 : index
    %c0_4 = arith.constant 0 : index
    %4 = vector.load %arg3[%c0_3, %c0_4] : memref<256x1xf32, #tpu.memory_space<vmem>>, vector<256x1xf32>
    %c0_5 = arith.constant 0 : index
    %c0_6 = arith.constant 0 : index
    %5 = vector.load %arg4[%c0_5, %c0_6] : memref<256x1xf32, #tpu.memory_space<vmem>>, vector<256x1xf32>
    %6 = vector.broadcast %4 : vector<256x1xf32> to vector<256x128xf32>
    %7 = arith.mulf %6, %1 : vector<256x128xf32>
    %8 = vector.broadcast %5 : vector<256x1xf32> to vector<256x128xf32>
    %9 = arith.mulf %8, %3 : vector<256x128xf32>
    %10 = arith.addf %7, %9 : vector<256x128xf32>
    %11 = arith.truncf %10 : vector<256x128xf32> to vector<256x128xbf16>
    %c0_7 = arith.constant 0 : index
    %c0_8 = arith.constant 0 : index
    %12 = vector.load %arg5[%c0_7, %c0_8] : memref<128x256xbf16, #tpu.memory_space<vmem>>, vector<128x256xbf16>
    %cst = arith.constant dense<0.000000e+00> : vector<256x256xf32>
    %13 = tpu.matmul %11, %12, %cst {dimension_numbers = #tpu.dot_dimension_numbers<[1], [0], [0], [1], [0, 0, 1, 1], [], []>} : vector<256x128xbf16>, vector<128x256xbf16>, vector<256x256xf32> -> vector<256x256xf32>
    %c0_9 = arith.constant 0 : index
    %c0_10 = arith.constant 0 : index
    %14 = vector.load %arg6[%c0_9, %c0_10] : memref<1x256xf32, #tpu.memory_space<vmem>>, vector<1x256xf32>
    %15 = vector.broadcast %14 : vector<1x256xf32> to vector<256x256xf32>
    %16 = arith.addf %13, %15 : vector<256x256xf32>
    %c0_11 = arith.constant 0 : index
    %c0_12 = arith.constant 0 : index
    %17 = vector.load %arg7[%c0_11, %c0_12] : memref<1x256xf32, #tpu.memory_space<vmem>>, vector<1x256xf32>
    %18 = vector.broadcast %4 : vector<256x1xf32> to vector<256x256xf32>
    %19 = vector.broadcast %17 : vector<1x256xf32> to vector<256x256xf32>
    %20 = arith.mulf %18, %19 : vector<256x256xf32>
    %21 = arith.addf %16, %20 : vector<256x256xf32>
    %cst_13 = arith.constant 0.000000e+00 : f32
    %22 = vector.broadcast %cst_13 : f32 to vector<256x256xf32>
    %23 = arith.maximumf %21, %22 : vector<256x256xf32>
    %24 = arith.truncf %23 : vector<256x256xf32> to vector<256x256xbf16>
    %c0_14 = arith.constant 0 : index
    %c0_15 = arith.constant 0 : index
    %25 = vector.load %arg8[%c0_14, %c0_15] : memref<256x128xbf16, #tpu.memory_space<vmem>>, vector<256x128xbf16>
    %cst_16 = arith.constant dense<0.000000e+00> : vector<256x128xf32>
    %26 = tpu.matmul %24, %25, %cst_16 {dimension_numbers = #tpu.dot_dimension_numbers<[1], [0], [0], [1], [0, 0, 1, 1], [], []>} : vector<256x256xbf16>, vector<256x128xbf16>, vector<256x128xf32> -> vector<256x128xf32>
    %c0_17 = arith.constant 0 : index
    %c0_18 = arith.constant 0 : index
    %27 = vector.load %arg9[%c0_17, %c0_18] : memref<1x128xf32, #tpu.memory_space<vmem>>, vector<1x128xf32>
    %28 = vector.broadcast %27 : vector<1x128xf32> to vector<256x128xf32>
    %29 = arith.addf %26, %28 : vector<256x128xf32>
    %30 = arith.subf %29, %3 : vector<256x128xf32>
    %31 = math.absf %30 : vector<256x128xf32>
    %32 = vector.shape_cast %31 : vector<256x128xf32> to vector<32x8x128xf32>
    %cst_19 = arith.constant dense<0.000000e+00> : vector<8x128xf32>
    %33 = vector.multi_reduction <add>, %32, %cst_19 [0] : vector<32x8x128xf32> to vector<8x128xf32>
    %c0_20 = arith.constant 0 : index
    %c0_21 = arith.constant 0 : index
    %34 = vector.load %arg10[%c0_20, %c0_21] : memref<8x128xf32, #tpu.memory_space<vmem>>, vector<8x128xf32>
    tpu.vector_store %arg10[%c0_20, %c0_21], %33 {strides = array<i32>} : memref<8x128xf32, #tpu.memory_space<vmem>>, vector<8x128xf32>,
    return
  }
  func.func @transform_0(%arg0: i32) -> (i32, i32) {
    %c0_i32 = arith.constant 0 : i32
    %c0_i32_0 = arith.constant 0 : i32
    return %arg0, %c0_i32 : i32, i32
  }
  func.func @transform_1(%arg0: i32) -> (i32, i32) {
    %c0_i32 = arith.constant 0 : i32
    %c0_i32_0 = arith.constant 0 : i32
    return %arg0, %c0_i32 : i32, i32
  }
  func.func @transform_2(%arg0: i32) -> (i32, i32) {
    %c0_i32 = arith.constant 0 : i32
    %c0_i32_0 = arith.constant 0 : i32
    return %arg0, %c0_i32 : i32, i32
  }
  func.func @transform_3(%arg0: i32) -> (i32, i32) {
    %c0_i32 = arith.constant 0 : i32
    %c0_i32_0 = arith.constant 0 : i32
    return %arg0, %c0_i32 : i32, i32
  }
  func.func @transform_4(%arg0: i32) -> (i32, i32) {
    %c0_i32 = arith.constant 0 : i32
    %c0_i32_0 = arith.constant 0 : i32
    %c0_i32_1 = arith.constant 0 : i32
    return %c0_i32, %c0_i32_0 : i32, i32
  }
  func.func @transform_5(%arg0: i32) -> (i32, i32) {
    %c0_i32 = arith.constant 0 : i32
    %c0_i32_0 = arith.constant 0 : i32
    %c0_i32_1 = arith.constant 0 : i32
    return %c0_i32, %c0_i32_0 : i32, i32
  }
  func.func @transform_6(%arg0: i32) -> (i32, i32) {
    %c0_i32 = arith.constant 0 : i32
    %c0_i32_0 = arith.constant 0 : i32
    %c0_i32_1 = arith.constant 0 : i32
    return %c0_i32, %c0_i32_0 : i32, i32
  }
  func.func @transform_7(%arg0: i32) -> (i32, i32) {
    %c0_i32 = arith.constant 0 : i32
    %c0_i32_0 = arith.constant 0 : i32
    %c0_i32_1 = arith.constant 0 : i32
    return %c0_i32, %c0_i32_0 : i32, i32
  }
  func.func @transform_8(%arg0: i32) -> (i32, i32) {
    %c0_i32 = arith.constant 0 : i32
    %c0_i32_0 = arith.constant 0 : i32
    %c0_i32_1 = arith.constant 0 : i32
    return %c0_i32, %c0_i32_0 : i32, i32
  }
  func.func @transform_9(%arg0: i32) -> (i32, i32) {
    %c0_i32 = arith.constant 0 : i32
    %c0_i32_0 = arith.constant 0 : i32
    return %arg0, %c0_i32 : i32, i32
  }
}

</mosaic_0001>

<bundles_post_ra>
// kernel: tpu_custom_call.1
= control target key start
LH: loop header
LB: loop body
LE: loop exit
PB: predicated region body
PF: predicated region fallthrough
CT: control target
= control target key end

     0   :  { %s3420_s0 = inlined_call_operand.vmem [shape: bf16[512,128], index: 0, kind: input, shape index: {}]   ;;  %s3421_s1 = inlined_call_operand.vmem [shape: bf16[512,128], index: 1, kind: input, shape index: {}]   ;;  %s3422_s2 = inlined_call_operand.vmem [shape: f32[512,1], index: 2, kind: input, shape index: {}]   ;;  %s3423_s3 = inlined_call_operand.vmem [shape: f32[512,1], index: 3, kind: input, shape index: {}]   ;;  %s3424_s4 = inlined_call_operand.vmem [shape: bf16[128,256], index: 4, kind: input, shape index: {}]   ;;  %s3425_s5 = inlined_call_operand.vmem [shape: f32[1,256], index: 5, kind: input, shape index: {}]   ;;  %s3426_s6 = inlined_call_operand.vmem [shape: f32[1,256], index: 6, kind: input, shape index: {}]   ;;  %s3427_s7 = inlined_call_operand.vmem [shape: bf16[256,128], index: 7, kind: input, shape index: {}]   ;;  %s3428_s8 = inlined_call_operand.vmem [shape: f32[1,128], index: 8, kind: input, shape index: {}]   ;;  %s3429_s9 = inlined_call_operand.hbm [shape: f32[16,128], index: 9, kind: output, shape index: {}]  }
   0x1   :  { %3463 = sst [smem:[#allocation6_spill]] %s3422_s2 }
   0x2   :  { %14 = vsyncpa [#allocation3], 0 }
   0x3   :  { %16 = vsyncpa [#allocation3 + $0x1], 0  ;;  %s2544_s30 = smov 0   ;;  %s2546_s10 = smov 0  }
   0x4   :  { %s2548_s11 = smov 0   ;;  %s2550_s12 = smov 0  }
   0x5 LB: > { %s2565_s13 = sadd.s32 4294967295, %s2491_s12   ;;  %s2050_s14 = sadd.s32 4294967294, %s2491_s12   ;;  %s2491_s12 = sphi %s2550_s12, %s3503_s12   ;;  %s2487_s11 = sphi %s2548_s11, %s3502_s11   ;;  %s2483_s10 = sphi %s2546_s10, %s3501_s10   ;;  %s2479_s30 = sphi %s2544_s30, %s3500_s30  }
   0x6   : > { %s2569_s15 = sadd.s32 1, %s2491_s12   ;;  %s238_s16 = sadd.s32 1, %s2487_s11 }
   0x7   : > { %s235_s17 = ssub.s32 %s2491_s12, %s2569_s15  ;;  %p248_p0 = scmp.ne.s32.totalorder %s2487_s11, %s2483_s10 }
   0x8   : > { %p236_p1 = scmp.eq.s32.totalorder %s235_s17, 0  ;;  %p249_p2 = scmp.eq.s32.totalorder %s2565_s13, 1 }
   0x9   : > { %p254_p3 = scmp.ne.s32.totalorder %s2483_s10, %s2479_s30  ;;  %p255_p4 = scmp.eq.s32.totalorder %s2050_s14, 1 }
   0xa   : > { %s2580_s18 = scalar_select %p236_p1, %s2487_s11, %s238_s16  }
   0xb   : > { %p2582_p5 = por %p249_p2, %p248_p0  ;;  %p2586_p6 = por %p255_p4, %p254_p3 }
   0xc   : > { %p2053_p7 = scmp.ge.s32.totalorder %s2491_s12, 1  ;;  %p324_p8 = scmp.lt.s32.totalorder %s2491_s12, 3 }
   0xe   : > { %p325_p9 = pnand %p2053_p7, %p324_p8 }
  0x10   : > { %328 = sbr.rel (%p325_p9) target bundleno = 693 (0x2b5), region = 56 }
  0x15   : > { %s2055_s21 = sshll.u32 %s2565_s13, 5  ;;  %v2493_v0 = vmov 0   ;;  %s3466_s2 = sld [smem:[#allocation6_spill]]  ;;  %v2121_v28 = vld [vmem:[%s3424_s4 + $0x70] sm:$0xf] }
  0x16   : > { %2427 = vset.pattern.permute.xlu2 %v2493_v0  ;;  %2426 = vset.pattern.permute.xlu1 %v2493_v0  ;;  %p376_p10 = scmp.lt.s32.totalorder %s2055_s21, 63  ;;  %v2210_v29 = vld [vmem:[%s3424_s4 + $0x74] sm:$0xf0]  ;;  %v2209_v30 = vld [vmem:[%s3424_s4 + $0x74] sm:$0xf]  ;;  %s372_s14 = sand.u32 1, %s2483_s10  }
  0x17   : > { %2425 = vset.pattern.permute.xlu0 %v2493_v0  ;;  %v2123_v31 = vld [vmem:[%s3424_s4 + $0x78] sm:$0xf0]  ;;  %v2122_v32 = vor.u32 %v2210_v29, %v2121_v28  ;;  %v2113_v34 = vld [vmem:[%s3424_s4 + $0x60] sm:$0xf]  ;;  %v2208_v35 = vld [vmem:[%s3424_s4 + $0x64] sm:$0xf0] }
  0x18   : > { %s3505_s21 = smov (!%p376_p10, %s2055_s21), 63  ;;  %v2126_v33 = vor.u32 %v2209_v30, %v2123_v31  ;;  %v2207_v36 = vld [vmem:[%s3424_s4 + $0x64] sm:$0xf]  ;;  %v2115_v37 = vld [vmem:[%s3424_s4 + $0x68] sm:$0xf0]  ;;  %v2114_v40 = vor.u32 %v2208_v35, %v2113_v34  ;;  %s2054_s16 = sshll.u32 %s372_s14, 3 }
  0x19   : > { %s2060_s22 = sshll.u32 %s3505_s21, 3  ;;  %1125 = vmatpush.bf16.msra.mxu0 %v2122_v32  ;;  %v2118_v42 = vor.u32 %v2207_v36, %v2115_v37  ;;  %v2105_v43 = vld [vmem:[%s3424_s4 + $0x50] sm:$0xf]  ;;  %v2206_v44 = vld [vmem:[%s3424_s4 + $0x54] sm:$0xf0]  ;;  %s2192_s17 = sshll.u32 %s2565_s13, 3 }
  0x1a   : > { %s2599_s25 = scalar_lea.vmem %s3423_s3, %s2060_s22  ;;  %1214 = vmatpush.bf16.msra.mxu1 %v2126_v33  ;;  %v2205_v45 = vld [vmem:[%s3424_s4 + $0x54] sm:$0xf]  ;;  %v2107_v46 = vld [vmem:[%s3424_s4 + $0x58] sm:$0xf0]  ;;  %v2106_v47 = vor.u32 %v2206_v44, %v2105_v43  ;;  %v2097_v49 = vld [vmem:[%s3424_s4 + $0x40] sm:$0xf] }
  0x1b   : > { %s2604_s28 = scalar_lea.vmem %s3466_s2, %s2060_s22  ;;  %v559_v1 = vld [vmem:[%s2599_s25] sm:$0xff]  ;;  %v560_v4 = vld [vmem:[%s2599_s25 + $0x8] sm:$0xff]  ;;  %v562_v7 = vld [vmem:[%s2599_s25 + $0x18] sm:$0xff]  ;;  %v2110_v48 = vor.u32 %v2205_v45, %v2107_v46  ;;  %s2056_s22 = sshll.u32 %s3505_s21, 2 }
  0x1c   : > { %v529_v2 = vld [vmem:[%s2604_s28 + $0x10] sm:$0xff]  ;;  %v527_v3 = vld [vmem:[%s2604_s28] sm:$0xff]  ;;  %785 = vperm.xlu1 %2426, %v559_v1   ;;  %v530_v5 = vld [vmem:[%s2604_s28 + $0x18] sm:$0xff]  ;;  %s2751_s24 = scalar_lea.vmem %s3420_s0, %s2056_s22  ;;  %s2756_s29 = scalar_lea.vmem %s3421_s1, %s2056_s22 }
  0x1d   : > { %603 = vperm.xlu2 %2427, %v529_v2   ;;  %593 = vperm.xlu0 %2425, %v527_v3   ;;  %v528_v6 = vld [vmem:[%s2604_s28 + $0x8] sm:$0xff]  ;;  %v531_v8 = vld [vmem:[%s2604_s28 + $0x20] sm:$0xff]  ;;  %v561_v9 = vld [vmem:[%s2599_s25 + $0x10] sm:$0xff]  ;;  %s1950_s2 = scalar_lea.hbm %s3429_s9, %s2192_s17  ;;  %s374_s26 = scalar_lea.vmem [#allocation2], %s2054_s16 }
  0x1e   : > { %v563_v10 = vld [vmem:[%s2599_s25 + $0x20] sm:$0xff]  ;;  %v564_v11 = vld [vmem:[%s2599_s25 + $0x28] sm:$0xff]  ;;  %v534_v13 = vld [vmem:[%s2604_s28 + $0x38] sm:$0xff]  ;;  %1126 = vmatpush.bf16.msra.mxu0 %v2114_v40  ;;  %1215 = vmatpush.bf16.msra.mxu1 %v2118_v42  ;;  %s1952_s27 = sshll.u32 %s374_s26, 4  ;;  %s1954_s13 = sshll.u32 %s1950_s2, 4  ;;  %s1953_s27 = int_to_ptr.vmem [resolvable:$true] %s1952_s27  ;;  %s1955_s13 = int_to_ptr.hbm [resolvable:$true] %s1954_s13 }
  0x1f   : > { %v532_v12 = vld [vmem:[%s2604_s28 + $0x28] sm:$0xff]  ;;  %v565_v14 = vld [vmem:[%s2599_s25 + $0x30] sm:$0xff]  ;;  %v535_v16 = vld [vmem:[%s2604_s28 + $0x40] sm:$0xff]  ;;  %s1940_s21 = scalar_lea.sflag [#allocation3], %s372_s14  ;;  %s2449_s16 = scalar_lea.hbm %s3429_s9, 16 }
  0x20   : > { %v533_v15 = vld [vmem:[%s2604_s28 + $0x30] sm:$0xff]  ;;  %v536_v17 = vld [vmem:[%s2604_s28 + $0x48] sm:$0xff]  ;;  %v566_v18 = vld [vmem:[%s2599_s25 + $0x38] sm:$0xff] }
  0x21   : > { %v568_v19 = vld [vmem:[%s2599_s25 + $0x48] sm:$0xff]  ;;  %v537_v20 = vld [vmem:[%s2604_s28 + $0x50] sm:$0xff]  ;;  %v567_v21 = vld [vmem:[%s2599_s25 + $0x40] sm:$0xff] }
  0x22   : > { %v569_v22 = vld [vmem:[%s2599_s25 + $0x50] sm:$0xff]  ;;  %v570_v23 = vld [vmem:[%s2599_s25 + $0x58] sm:$0xff]  ;;  %v540_v25 = vld [vmem:[%s2604_s28 + $0x68] sm:$0xff]  ;;  %1127 = vmatpush.bf16.msra.mxu0 %v2106_v47  ;;  %1216 = vmatpush.bf16.msra.mxu1 %v2110_v48 }
  0x23   : > { %v538_v24 = vld [vmem:[%s2604_s28 + $0x58] sm:$0xff]  ;;  %v571_v26 = vld [vmem:[%s2599_s25 + $0x60] sm:$0xff]  ;;  %v541_v38 = vld [vmem:[%s2604_s28 + $0x70] sm:$0xff] }
  0x24   : > { %790 = vperm.xlu1 %2426, %v560_v4   ;;  %v539_v27 = vld [vmem:[%s2604_s28 + $0x60] sm:$0xff]  ;;  %v542_v39 = vld [vmem:[%s2604_s28 + $0x78] sm:$0xff]  ;;  %v572_v41 = vld [vmem:[%s2599_s25 + $0x68] sm:$0xff] }
  0x25   : > { %608 = vperm.xlu2 %2427, %v530_v5   ;;  %598 = vperm.xlu0 %2425, %v528_v6   ;;  %v2204_v50 = vld [vmem:[%s3424_s4 + $0x44] sm:$0xf0]  ;;  %v2203_v51 = vld [vmem:[%s3424_s4 + $0x44] sm:$0xf]  ;;  %v2099_v52 = vld [vmem:[%s3424_s4 + $0x48] sm:$0xf0] }
  0x26   : > { %v574_v53 = vld [vmem:[%s2599_s25 + $0x78] sm:$0xff]  ;;  %v543_v54 = vld [vmem:[%s2604_s28 + $0x80] sm:$0xff]  ;;  %v2098_v55 = vor.u32 %v2204_v50, %v2097_v49  ;;  %v573_v56 = vld [vmem:[%s2599_s25 + $0x70] sm:$0xff]  ;;  %v2102_v57 = vor.u32 %v2203_v51, %v2099_v52 }
  0x27   : > { %v2089_v58 = vld [vmem:[%s3424_s4 + $0x30] sm:$0xf]  ;;  %v2202_v59 = vld [vmem:[%s3424_s4 + $0x34] sm:$0xf0]  ;;  %v2201_v60 = vld [vmem:[%s3424_s4 + $0x34] sm:$0xf] }
  0x28   : > { %1128 = vmatpush.bf16.msra.mxu0 %v2098_v55  ;;  %v2091_v61 = vld [vmem:[%s3424_s4 + $0x38] sm:$0xf0]  ;;  %1217 = vmatpush.bf16.msra.mxu1 %v2102_v57  ;;  %v2090_v62 = vor.u32 %v2202_v59, %v2089_v58  ;;  %v2081_v0 = vld [vmem:[%s3424_s4 + $0x20] sm:$0xf]  ;;  %v2200_v1 = vld [vmem:[%s3424_s4 + $0x24] sm:$0xf0] }
  0x29   : > { %v2094_v63 = vor.u32 %v2201_v60, %v2091_v61  ;;  %v2199_v2 = vld [vmem:[%s3424_s4 + $0x24] sm:$0xf]  ;;  %v576_v4 = vld [vmem:[%s2599_s25 + $0x88] sm:$0xff]  ;;  %v2082_v5 = vor.u32 %v2200_v1, %v2081_v0  ;;  %v549_v28 = vld [vmem:[%s2604_s28 + $0xb0] sm:$0xff] }
  0x2a   : > { %v575_v3 = vld [vmem:[%s2599_s25 + $0x80] sm:$0xff]  ;;  %v2083_v6 = vld [vmem:[%s3424_s4 + $0x28] sm:$0xf0]  ;;  %v581_v34 = vld [vmem:[%s2599_s25 + $0xb0] sm:$0xff] }
  0x2b   : > { %v579_v29 = vld [vmem:[%s2599_s25 + $0xa0] sm:$0xff]  ;;  %v582_v35 = vld [vmem:[%s2599_s25 + $0xb8] sm:$0xff]  ;;  %v552_v48 = vld [vmem:[%s2604_s28 + $0xc8] sm:$0xff] }
  0x2c   : > { %800 = vperm.xlu1 %2426, %v562_v7   ;;  %1129 = vmatpush.bf16.msra.mxu0 %v2090_v62  ;;  %v544_v7 = vld [vmem:[%s2604_s28 + $0x88] sm:$0xff]  ;;  %v2759_v31 = vld [vmem:[%s2756_s29] sm:$0xff]   ;;  %v554_v0 = vld [vmem:[%s2604_s28 + $0xd8] sm:$0xff] }
  0x2d   : > { %613 = vperm.xlu2 %2427, %v531_v8   ;;  %795 = vperm.xlu0 %2425, %v561_v9   ;;  %v2086_v8 = vor.u32 %v2199_v2, %v2083_v6  ;;  %v2073_v9 = vld [vmem:[%s3424_s4 + $0x10] sm:$0xf]  ;;  %v2228_v33 = vld [vmem:[%s2751_s24] sm:$0xff]   ;;  %v3460_v36 = vunpack.c.l.bf16 %v2759_v31  ;;  %v2784_v55 = vld [vmem:[%s2756_s29 + $0x8] sm:$0xff]  }
  0x2e   : > { %1218 = vmatpush.bf16.msra.mxu1 %v2094_v63  ;;  %v2229_v37 = vunpack.c.l.bf16 %v2228_v33  ;;  %v2230_v40 = vunpack.c.h.bf16 %v2228_v33  ;;  %v583_v49 = vld [vmem:[%s2599_s25 + $0xc0] sm:$0xff]  ;;  %v3451_v59 = vunpack.c.h.bf16 %v2784_v55  ;;  %v3452_v60 = vunpack.c.l.bf16 %v2784_v55  ;;  %v553_v63 = vld [vmem:[%s2604_s28 + $0xd0] sm:$0xff]  ;;  %v584_v1 = vld [vmem:[%s2599_s25 + $0xc8] sm:$0xff] }
  0x2f   : > { %v551_v50 = vld [vmem:[%s2604_s28 + $0xc0] sm:$0xff] }
  0x30   : > { %1130 = vmatpush.bf16.msra.mxu0 %v2082_v5 }
  0x32   : > { %1219 = vmatpush.bf16.msra.mxu1 %v2086_v8  ;;  %v586_v8 = vld [vmem:[%s2599_s25 + $0xd8] sm:$0xff] }
  0x34   : > { %805 = vperm.xlu1 %2426, %v563_v10   ;;  %v2198_v10 = vld [vmem:[%s3424_s4 + $0x14] sm:$0xf0] }
  0x35   : > { %810 = vperm.xlu2 %2427, %v564_v11   ;;  %618 = vperm.xlu0 %2425, %v532_v12   ;;  %v2197_v11 = vld [vmem:[%s3424_s4 + $0x14] sm:$0xf]  ;;  %v2075_v12 = vld [vmem:[%s3424_s4 + $0x18] sm:$0xf0] }
  0x3c   : > { %628 = vperm.xlu1 %2426, %v534_v13   ;;  %v2074_v13 = vor.u32 %v2198_v10, %v2073_v9  ;;  %v555_v9 = vld [vmem:[%s2604_s28 + $0xe0] sm:$0xff]  ;;  %v585_v10 = vld [vmem:[%s2599_s25 + $0xd0] sm:$0xff] }
  0x3d   : > { %815 = vperm.xlu2 %2427, %v565_v14   ;;  %623 = vperm.xlu0 %2425, %v533_v15   ;;  %v2078_v14 = vor.u32 %v2197_v11, %v2075_v12  ;;  %v2065_v15 = vld [vmem:[%s3424_s4] sm:$0xf] }
  0x3e   : > { %1131 = vmatpush.bf16.msra.mxu0 %v2074_v13 }
  0x3f   : > { %1220 = vmatpush.bf16.msra.mxu1 %v2078_v14  ;;  %v2356_v14 = vld [vmem:[%s2751_s24 + $0x10] sm:$0xff]  }
  0x44   : > { %633 = vperm.xlu1 %2426, %v535_v16   ;;  %v2196_v16 = vld [vmem:[%s3424_s4 + $0x4] sm:$0xf0] }
  0x45   : > { %638 = vperm.xlu2 %2427, %v536_v17   ;;  %820 = vperm.xlu0 %2425, %v566_v18   ;;  %v2195_v17 = vld [vmem:[%s3424_s4 + $0x4] sm:$0xf]  ;;  %v546_v18 = vld [vmem:[%s2604_s28 + $0x98] sm:$0xff] }
  0x4c   : > { %830 = vperm.xlu1 %2426, %v568_v19   ;;  %v577_v19 = vld [vmem:[%s2599_s25 + $0x90] sm:$0xff] }
  0x4d   : > { %643 = vperm.xlu2 %2427, %v537_v20   ;;  %825 = vperm.xlu0 %2425, %v567_v21   ;;  %v2066_v20 = vor.u32 %v2196_v16, %v2065_v15  ;;  %v2067_v21 = vld [vmem:[%s3424_s4 + $0x8] sm:$0xf0]  ;;  %v2808_v15 = vld [vmem:[%s2756_s29 + $0x10] sm:$0xff]  }
  0x4e   : > { %v3448_v16 = vunpack.c.l.bf16 %v2808_v15 }
  0x4f   : > { %1132 = vmatpush.bf16.msra.mxu0 %v2066_v20  ;;  %v588_v20 = vld [vmem:[%s2599_s25 + $0xe8] sm:$0xff] }
  0x54   : > { %835 = vperm.xlu1 %2426, %v569_v22   ;;  %v545_v22 = vld [vmem:[%s2604_s28 + $0x90] sm:$0xff] }
  0x55   : > { %840 = vperm.xlu2 %2427, %v570_v23   ;;  %648 = vperm.xlu0 %2425, %v538_v24   ;;  %v2070_v23 = vor.u32 %v2195_v17, %v2067_v21  ;;  %v547_v24 = vld [vmem:[%s2604_s28 + $0xa0] sm:$0xff]  ;;  %v2238_v17 = vunpack.c.h.bf16 %v2356_v14  ;;  %v2237_v21 = vunpack.c.l.bf16 %v2356_v14 }
  0x57   : > { %1221 = vmatpush.bf16.msra.mxu1 %v2070_v23  ;;  %v556_v23 = vld [vmem:[%s2604_s28 + $0xe8] sm:$0xff] }
  0x5c   : > { %658 = vperm.xlu1 %2426, %v540_v25   ;;  %v548_v25 = vld [vmem:[%s2604_s28 + $0xa8] sm:$0xff] }
  0x5d   : > { %845 = vperm.xlu2 %2427, %v571_v26   ;;  %653 = vperm.xlu0 %2425, %v539_v27   ;;  %v578_v26 = vld [vmem:[%s2599_s25 + $0x98] sm:$0xff]  ;;  %v580_v27 = vld [vmem:[%s2599_s25 + $0xa8] sm:$0xff] }
  0x64   : > { %663 = vperm.xlu1 %2426, %v541_v38   ;;  %v550_v38 = vld [vmem:[%s2604_s28 + $0xb8] sm:$0xff] }
  0x65   : > { %668 = vperm.xlu2 %2427, %v542_v39   ;;  %850 = vperm.xlu0 %2425, %v572_v41   ;;  %v3457_v39 = vunpack.c.h.bf16 %v2759_v31 }
  0x6c   : > { %860 = vperm.xlu1 %2426, %v574_v53   ;;  %v2355_v53 = vld [vmem:[%s2751_s24 + $0x8] sm:$0xff]  }
  0x6d   : > { %673 = vperm.xlu2 %2427, %v543_v54   ;;  %855 = vperm.xlu0 %2425, %v573_v56   ;;  %v2233_v56 = vunpack.c.l.bf16 %v2355_v53  ;;  %v2234_v58 = vunpack.c.h.bf16 %v2355_v53 }
  0x74   : > { %865 = vperm.xlu1 %2426, %v575_v3  }
  0x75   : > { %870 = vperm.xlu2 %2427, %v576_v4   ;;  %678 = vperm.xlu0 %2425, %v544_v7  }
  0x77   : > { %v2769_v41 = vpop.permute.xlu2 %603 }
  0x78   : > { %v753_v2 = vmul.f32 %v2233_v56, %v2769_v41 }
  0x7c   : > { %688 = vperm.xlu1 %2426, %v546_v18  }
  0x7d   : > { %875 = vperm.xlu2 %2427, %v577_v19   ;;  %683 = vperm.xlu0 %2425, %v545_v22   ;;  %v587_v19 = vld [vmem:[%s2599_s25 + $0xe0] sm:$0xff]  ;;  %v3443_v22 = vunpack.c.h.bf16 %v2808_v15 }
  0x7f   : > { %v2786_v57 = vpop.permute.xlu2 %608 }
  0x80   : > { %v754_v3 = vmul.f32 %v2234_v58, %v2786_v57 }
  0x84   : > { %693 = vperm.xlu1 %2426, %v547_v24  }
  0x85   : > { %698 = vperm.xlu2 %2427, %v548_v25   ;;  %880 = vperm.xlu0 %2425, %v578_v26  }
  0x87   : > { %v2802_v11 = vpop.permute.xlu2 %613 }
  0x8c   : > { %890 = vperm.xlu1 %2426, %v580_v27   ;;  %v755_v27 = vmul.f32 %v2237_v21, %v2802_v11 }
  0x8d   : > { %703 = vperm.xlu2 %2427, %v549_v28   ;;  %885 = vperm.xlu0 %2425, %v579_v29  }
  0x8e   : > { %v786_v30 = vpop.permute.xlu1 %785 }
  0x8f   : > { %v2761_v32 = vpop.permute.xlu0 %593  ;;  %v943_v42 = vmul.f32 %v3460_v36, %v786_v30  ;;  %v811_v26 = vpop.permute.xlu2 %810 }
  0x90   : > { %v751_v43 = vmul.f32 %v2229_v37, %v2761_v32  ;;  %v948_v28 = vmul.f32 %v3443_v22, %v811_v26  ;;  %v557_v37 = vld [vmem:[%s2604_s28 + $0xf0] sm:$0xff] }
  0x91   : > { %v3014_v22 = vld [vmem:[%s2756_s29 + $0x50] sm:$0xff]  }
  0x92   : > { %v975_v51 = vadd.f32 %v943_v42, %v751_v43  ;;  %v2829_v42 = vld [vmem:[%s2756_s29 + $0x18] sm:$0xff]  }
  0x93   : > { %v2357_v43 = vld [vmem:[%s2751_s24 + $0x18] sm:$0xff]  }
  0x94   : > { %895 = vperm.xlu1 %2426, %v581_v34   ;;  %v558_v34 = vld [vmem:[%s2604_s28 + $0xf8] sm:$0xff] }
  0x95   : > { %900 = vperm.xlu2 %2427, %v582_v35   ;;  %708 = vperm.xlu0 %2425, %v550_v38   ;;  %v589_v35 = vld [vmem:[%s2599_s25 + $0xf0] sm:$0xff] }
  0x96   : > { %v791_v44 = vpop.permute.xlu1 %790 }
  0x97   : > { %v944_v45 = vmul.f32 %v3457_v39, %v791_v44  ;;  %v2776_v46 = vpop.permute.xlu0 %598  ;;  %v3440_v44 = vunpack.c.h.bf16 %v2829_v42 }
  0x98   : > { %v752_v47 = vmul.f32 %v2230_v40, %v2776_v46 }
  0x9a   : > { %v976_v52 = vadd.f32 %v944_v45, %v752_v47  ;;  %v2242_v47 = vunpack.c.h.bf16 %v2357_v43 }
  0x9c   : > { %718 = vperm.xlu1 %2426, %v552_v48   ;;  %v1007_v54 = vpack.c.bf16 %v976_v52, %v975_v51  ;;  %v2241_v48 = vunpack.c.l.bf16 %v2357_v43  ;;  %v816_v52 = vpop.permute.xlu2 %815 }
  0x9d   : > { %905 = vperm.xlu2 %2427, %v583_v49   ;;  %713 = vperm.xlu0 %2425, %v551_v50   ;;  %v590_v49 = vld [vmem:[%s2599_s25 + $0xf8] sm:$0xff]  ;;  %v3442_v50 = vunpack.c.l.bf16 %v2829_v42  ;;  %s2443_s25 = sshra.s32 %s1955_s13, 4  ;;  %s2444_s25 = int_to_ptr.hbm [resolvable:$true] %s2443_s25 }
  0x9e   : > { %1133 = vmatmul.bf16.vlgmr.msra.gmra.mxu0 %v1007_v54  ;;  %1222 = vmatmul.bf16.vlgmr.msra.gmra.mxu1 %v1007_v54  ;;  %v801_v61 = vpop.permute.xlu1 %800  ;;  %s2445_s28 = scalar_lea.hbm %s2444_s25, 8  ;;  %p2450_p0 = scmp.lt.s32.totalorder %s2444_s25, %s3429_s9 }
  0x9f   : > { %v796_v62 = vpop.permute.xlu0 %795  ;;  %v946_v4 = vmul.f32 %v3451_v59, %v801_v61  ;;  %v949_v58 = vmul.f32 %v3442_v50, %v816_v52  ;;  %p2446_p11 = scmp.ne.s32.totalorder %s2444_s25, %s2445_s28  ;;  %p2451_p1 = scmp.lt.s32.totalorder %s2449_s16, %s2445_s28 }
  0xa0   : > { %v945_v5 = vmul.f32 %v3452_v60, %v796_v62  ;;  %v3098_v60 = vld [vmem:[%s2756_s29 + $0x68] sm:$0xff]  }
  0xa1   : > { %v978_v6 = vadd.f32 %v946_v4, %v754_v3  ;;  %p2447_p12 = pnand %p2446_p11, %p2582_p5  ;;  %p2452_p2 = por %p2451_p1, %p2450_p0 }
  0xa2   : > { %v977_v7 = vadd.f32 %v945_v5, %v753_v2  ;;  %v2358_v2 = vld [vmem:[%s2751_s24 + $0x20] sm:$0xff]  }
  0xa3   : > { %p2448_p13 = pneg %p2447_p12 }
  0xa4   : > { %723 = vperm.xlu1 %2426, %v553_v63   ;;  %v1008_v12 = vpack.c.bf16 %v978_v6, %v977_v7  ;;  %v2246_v7 = vunpack.c.h.bf16 %v2358_v2 }
  0xa5   : > { %728 = vperm.xlu2 %2427, %v554_v0   ;;  %910 = vperm.xlu0 %2425, %v584_v1   ;;  %v2844_v0 = vld [vmem:[%s2756_s29 + $0x20] sm:$0xff]   ;;  %v2846_v1 = vpop.permute.xlu2 %638  ;;  %p2453_p3 = pnand %p2452_p2, %p2448_p13 }
  0xa6   : > { %v806_v18 = vpop.permute.xlu1 %805  ;;  %v3438_v3 = vunpack.c.h.bf16 %v2844_v0  ;;  %v3439_v4 = vunpack.c.l.bf16 %v2844_v0 }
  0xa7   : > { %v2804_v13 = vpop.permute.xlu0 %618  ;;  %v947_v24 = vmul.f32 %v3448_v16, %v806_v18 }
  0xa8   : > { %v756_v25 = vmul.f32 %v2238_v17, %v2804_v13 }
  0xa9   : > { %v979_v30 = vadd.f32 %v947_v24, %v755_v27  ;;  %v2863_v24 = vld [vmem:[%s2756_s29 + $0x28] sm:$0xff]  }
  0xaa   : > { %v980_v33 = vadd.f32 %v948_v28, %v756_v25  ;;  %v3437_v25 = vunpack.c.l.bf16 %v2863_v24 }
  0xac   : > { %920 = vperm.xlu1 %2426, %v586_v8   ;;  %v1009_v38 = vpack.c.bf16 %v980_v33, %v979_v30  ;;  %v2245_v8 = vunpack.c.l.bf16 %v2358_v2  ;;  %v3436_v30 = vunpack.c.h.bf16 %v2863_v24 }
  0xad   : > { %733 = vperm.xlu2 %2427, %v555_v9   ;;  %915 = vperm.xlu0 %2425, %v585_v10  }
  0xae   : > { %1138 = vmatmul.bf16.gmra.mxu0 %v1008_v12  ;;  %1227 = vmatmul.bf16.gmra.mxu1 %v1008_v12  ;;  %v2826_v40 = vpop.permute.xlu1 %628  ;;  %v760_v12 = vmul.f32 %v2246_v7, %v2846_v1  ;;  %v2224_v7 = vld [vmem:[%s3427_s7 + $0x68] sm:$0xff] }
  0xaf   : > { %v2821_v29 = vpop.permute.xlu0 %623  ;;  %v758_v53 = vmul.f32 %v2242_v47, %v2826_v40 }
  0xb0   : > { %v757_v54 = vmul.f32 %v2241_v48, %v2821_v29  ;;  %v2218_v48 = vld [vmem:[%s3427_s7 + $0x38] sm:$0xff] }
  0xb1   : > { %1665 = vmatpush.bf16.msra.mxu2 %v2218_v48 }
  0xb2   : > { %v981_v62 = vadd.f32 %v949_v58, %v757_v54  ;;  %v2360_v54 = vld [vmem:[%s2751_s24 + $0x30] sm:$0xff]  }
  0xb3   : > { %v2217_v58 = vld [vmem:[%s3427_s7 + $0x30] sm:$0xff]  ;;  %v2254_v2 = vunpack.c.h.bf16 %v2360_v54 }
  0xb4   : > { %925 = vperm.xlu1 %2426, %v587_v19   ;;  %v2857_v19 = vpop.permute.xlu2 %643 }
  0xb5   : > { %930 = vperm.xlu2 %2427, %v588_v20   ;;  %738 = vperm.xlu0 %2425, %v556_v23   ;;  %v2359_v23 = vld [vmem:[%s2751_s24 + $0x28] sm:$0xff]  }
  0xb6   : > { %v2839_v56 = vpop.permute.xlu1 %633  ;;  %v2250_v26 = vunpack.c.h.bf16 %v2359_v23  ;;  %v2249_v28 = vunpack.c.l.bf16 %v2359_v23  ;;  %1666 = vmatpush.bf16.msra.mxu2 %v2217_v58 }
  0xb7   : > { %v821_v45 = vpop.permute.xlu0 %820  ;;  %v759_v14 = vmul.f32 %v2245_v8, %v2839_v56 }
  0xb8   : > { %v950_v51 = vmul.f32 %v3440_v44, %v821_v45 }
  0xba   : > { %v982_v61 = vadd.f32 %v950_v51, %v758_v53  ;;  %v2884_v53 = vld [vmem:[%s2756_s29 + $0x30] sm:$0xff]  }
  0xbb   : > { %v3435_v8 = vunpack.c.l.bf16 %v2884_v53 }
  0xbc   : > { %748 = vperm.xlu1 %2426, %v558_v34   ;;  %v1010_v63 = vpack.c.bf16 %v982_v61, %v981_v62  ;;  %v841_v33 = vpop.permute.xlu2 %840  ;;  %v2225_v61 = vld [vmem:[%s3427_s7 + $0x70] sm:$0xff]  ;;  %v3434_v62 = vunpack.c.h.bf16 %v2884_v53 }
  0xbd   : > { %935 = vperm.xlu2 %2427, %v589_v35   ;;  %743 = vperm.xlu0 %2425, %v557_v37   ;;  %v761_v37 = vmul.f32 %v2249_v28, %v2857_v19  ;;  %v2214_v28 = vld [vmem:[%s3427_s7 + $0x18] sm:$0xff] }
  0xbe   : > { %1143 = vmatmul.bf16.gmra.mxu0 %v1009_v38  ;;  %1232 = vmatmul.bf16.gmra.mxu1 %v1009_v38  ;;  %v831_v5 = vpop.permute.xlu1 %830  ;;  %v954_v38 = vmul.f32 %v3436_v30, %v841_v33  ;;  %v2222_v33 = vld [vmem:[%s3427_s7 + $0x58] sm:$0xff] }
  0xbf   : > { %v826_v6 = vpop.permute.xlu0 %825  ;;  %v952_v9 = vmul.f32 %v3438_v3, %v831_v5  ;;  %v2253_v5 = vunpack.c.l.bf16 %v2360_v54 }
  0xc0   : > { %v951_v10 = vmul.f32 %v3439_v4, %v826_v6  ;;  %v2216_v6 = vld [vmem:[%s3427_s7 + $0x28] sm:$0xff] }
  0xc1   : > { %v984_v17 = vadd.f32 %v952_v9, %v760_v12  ;;  %1667 = vmatpush.bf16.msra.mxu2 %v2216_v6 }
  0xc2   : > { %v983_v18 = vadd.f32 %v951_v10, %v759_v14 }
  0xc4   : > { %v1011_v20 = vpack.c.bf16 %v984_v17, %v983_v18  ;;  %v846_v10 = vpop.permute.xlu2 %845  ;;  %v2215_v18 = vld [vmem:[%s3427_s7 + $0x20] sm:$0xff] }
  0xc5   : > { %940 = vperm.xlu0 %2425, %v590_v49   ;;  %v2226_v49 = vld [vmem:[%s3427_s7 + $0x78] sm:$0xff]  ;;  %v955_v23 = vmul.f32 %v3435_v8, %v846_v10  ;;  %1668 = vmatpush.bf16.msra.mxu2 %v2215_v18  ;;  %v2211_v10 = vld [vmem:[%s3427_s7] sm:$0xff] }
  0xc6   : > { %v836_v27 = vpop.permute.xlu1 %835  ;;  %1754 = vmatpush.bf16.msra.mxu3 %v2226_v49 }
  0xc7   : > { %v2859_v21 = vpop.permute.xlu0 %648  ;;  %v953_v34 = vmul.f32 %v3437_v25, %v836_v27 }
  0xc8   : > { %v762_v35 = vmul.f32 %v2250_v26, %v2859_v21 }
  0xc9   : > { %v985_v45 = vadd.f32 %v953_v34, %v761_v37  ;;  %1669 = vmatpush.bf16.msra.mxu2 %v2214_v28  ;;  %v2959_v28 = vld [vmem:[%s2756_s29 + $0x40] sm:$0xff]  }
  0xca   : > { %v986_v47 = vadd.f32 %v954_v38, %v762_v35  ;;  %1755 = vmatpush.bf16.msra.mxu3 %v2225_v61  ;;  %v2922_v35 = vld [vmem:[%s2756_s29 + $0x38] sm:$0xff]  }
  0xcb   : > { %v2361_v38 = vld [vmem:[%s2751_s24 + $0x38] sm:$0xff]   ;;  %v3432_v48 = vunpack.c.h.bf16 %v2922_v35  ;;  %v3433_v49 = vunpack.c.l.bf16 %v2922_v35 }
  0xcc   : > { %v1012_v51 = vpack.c.bf16 %v986_v47, %v985_v45  ;;  %v2924_v37 = vpop.permute.xlu2 %668  ;;  %v2213_v45 = vld [vmem:[%s3427_s7 + $0x10] sm:$0xff]  ;;  %v2258_v58 = vunpack.c.h.bf16 %v2361_v38  ;;  %v2257_v61 = vunpack.c.l.bf16 %v2361_v38 }
  0xcd   : > { %v2221_v47 = vld [vmem:[%s3427_s7 + $0x50] sm:$0xff]  ;;  %1670 = vmatpush.bf16.msra.mxu2 %v2213_v45 }
  0xce   : > { %1148 = vmatmul.bf16.gmra.mxu0 %v1010_v63  ;;  %1237 = vmatmul.bf16.gmra.mxu1 %v1010_v63  ;;  %v2881_v52 = vpop.permute.xlu1 %658 }
  0xcf   : > { %v2873_v43 = vpop.permute.xlu0 %653  ;;  %1756 = vmatpush.bf16.msra.mxu3 %v2224_v7  ;;  %v764_v12 = vmul.f32 %v2254_v2, %v2881_v52  ;;  %v2220_v2 = vld [vmem:[%s3427_s7 + $0x48] sm:$0xff]  ;;  %v766_v7 = vmul.f32 %v2258_v58, %v2924_v37 }
  0xd0   : > { %v763_v14 = vmul.f32 %v2253_v5, %v2873_v43 }
  0xd2   : > { %v987_v27 = vadd.f32 %v955_v23, %v763_v14 }
  0xd6   : > { %v2905_v17 = vpop.permute.xlu1 %663 }
  0xd7   : > { %v851_v63 = vpop.permute.xlu0 %850 }
  0xd8   : > { %v956_v9 = vmul.f32 %v3434_v62, %v851_v63  ;;  %v2212_v63 = vld [vmem:[%s3427_s7 + $0x8] sm:$0xff] }
  0xd9   : > { %1671 = vmatpush.bf16.msra.mxu2 %v2212_v63 }
  0xda   : > { %v988_v26 = vadd.f32 %v956_v9, %v764_v12  ;;  %v765_v9 = vmul.f32 %v2257_v61, %v2905_v17  ;;  %v2219_v12 = vld [vmem:[%s3427_s7 + $0x40] sm:$0xff] }
  0xdc   : > { %v1013_v34 = vpack.c.bf16 %v988_v26, %v987_v27  ;;  %v2362_v27 = vld [vmem:[%s2751_s24 + $0x40] sm:$0xff]  }
  0xdd   : > { %1672 = vmatpush.bf16.msra.mxu2 %v2211_v10  ;;  %v2261_v45 = vunpack.c.l.bf16 %v2362_v27 }
  0xde   : > { %1153 = vmatmul.bf16.gmra.mxu0 %v1011_v20  ;;  %1242 = vmatmul.bf16.gmra.mxu1 %v1011_v20  ;;  %v2223_v20 = vld [vmem:[%s3427_s7 + $0x60] sm:$0xff] }
  0xdf   : > { %1757 = vmatpush.bf16.msra.mxu3 %v2223_v20  ;;  %v856_v54 = vpop.permute.xlu0 %855  ;;  %v2953_v20 = vpop.permute.xlu2 %673 }
  0xe0   : > { %v957_v6 = vmul.f32 %v3433_v49, %v856_v54  ;;  %v767_v61 = vmul.f32 %v2261_v45, %v2953_v20  ;;  %v2988_v45 = vld [vmem:[%s2756_s29 + $0x48] sm:$0xff]  }
  0xe2   : > { %v989_v18 = vadd.f32 %v957_v6, %v765_v9  ;;  %v1303_v9 = vld [vmem:[%s3426_s6] sm:$0x3] }
  0xe3   : > { %1758 = vmatpush.bf16.msra.mxu3 %v2222_v33  ;;  %v3431_v33 = vunpack.c.l.bf16 %v2959_v28 }
  0xe7   : > { %1759 = vmatpush.bf16.msra.mxu3 %v2221_v47  ;;  %v2955_v26 = vpop.permute.xlu0 %678  ;;  %v3430_v47 = vunpack.c.h.bf16 %v2959_v28 }
  0xeb   : > { %1760 = vmatpush.bf16.msra.mxu3 %v2220_v2 }
  0xee   : > { %1158 = vmatmul.bf16.gmra.mxu0 %v1012_v51  ;;  %1247 = vmatmul.bf16.gmra.mxu1 %v1012_v51  ;;  %v861_v51 = vpop.permute.xlu1 %860 }
  0xef   : > { %v958_v5 = vmul.f32 %v3432_v48, %v861_v51  ;;  %1761 = vmatpush.bf16.msra.mxu3 %v2219_v12  ;;  %v871_v51 = vpop.permute.xlu2 %870  ;;  %v2969_v2 = vpop.permute.xlu0 %683 }
  0xf0   : > { %v960_v63 = vmul.f32 %v3430_v47, %v871_v51  ;;  %v2363_v51 = vld [vmem:[%s2751_s24 + $0x48] sm:$0xff]  }
  0xf1   : > { %v990_v14 = vadd.f32 %v958_v5, %v766_v7  ;;  %v1039_v7 = vld [vmem:[%s3425_s5] sm:$0x3] }
  0xf3   : > { %v1014_v23 = vpack.c.bf16 %v990_v14, %v989_v18  ;;  %v2979_v18 = vperm.slane %v1039_v7, 0 }
  0xf6   : > { %v866_v38 = vpop.permute.xlu1 %865 }
  0xf7   : > { %v959_v54 = vmul.f32 %v3431_v33, %v866_v38  ;;  %v2985_v38 = vperm.slane %v1303_v9, 1  ;;  %v3446_v33 = vunpack.c.l.bf16 %v2988_v45  ;;  %v876_v49 = vpop.permute.xlu2 %875 }
  0xf9   : > { %v991_v5 = vadd.f32 %v959_v54, %v767_v61  ;;  %v3441_v54 = vunpack.c.h.bf16 %v2988_v45  ;;  %v881_v61 = vpop.permute.xlu0 %880  ;;  %v1312_v47 = vmul.f32 %v2985_v38, %v2776_v46  ;;  %v961_v44 = vmul.f32 %v3446_v33, %v876_v49 }
  0xfe   : > { %1163 = vmatmul.bf16.gmra.mxu0 %v1013_v34  ;;  %1252 = vmatmul.bf16.gmra.mxu1 %v1013_v34  ;;  %v2262_v34 = vunpack.c.h.bf16 %v2362_v27  ;;  %v2977_v14 = vpop.permute.xlu1 %688  ;;  %v2981_v27 = vperm.slane %v1039_v7, 1  ;;  %v2265_v7 = vunpack.c.l.bf16 %v2363_v51 }
 0x100   : > { %v768_v58 = vmul.f32 %v2262_v34, %v2955_v26  ;;  %v2983_v34 = vperm.slane %v1303_v9, 0  ;;  %v769_v25 = vmul.f32 %v2265_v7, %v2969_v2 }
 0x102   : > { %v992_v6 = vadd.f32 %v960_v63, %v768_v58  ;;  %v1311_v9 = vmul.f32 %v2983_v34, %v2776_v46 }
 0x106   : > { %v3009_v46 = vpop.permute.xlu1 %693 }
 0x10e   : > { %1168 = vmatmul.bf16.gmra.mxu0 %v1014_v23  ;;  %1257 = vmatmul.bf16.gmra.mxu1 %v1014_v23  ;;  %v1015_v23 = vpack.c.bf16 %v992_v6, %v991_v5  ;;  %v1309_v5 = vmul.f32 %v2983_v34, %v2761_v32  ;;  %v2266_v6 = vunpack.c.h.bf16 %v2363_v51 }
 0x110   : > { %v770_v30 = vmul.f32 %v2266_v6, %v2977_v14 }
 0x11b   : > { %v1134_v10 = vpop.f32.mrf.mxu0  ;;  %v1223_v12 = vpop.f32.mrf.mxu1 }
 0x11c   : > { %v1135_v58 = vadd.f32 %v1134_v10, %v2979_v18  ;;  %v1224_v63 = vadd.f32 %v1223_v12, %v2981_v27  ;;  %v962_v12 = vmul.f32 %v3441_v54, %v881_v61 }
 0x11e   : > { %1173 = vmatmul.bf16.gmra.mxu0 %v1015_v23  ;;  %1262 = vmatmul.bf16.gmra.mxu1 %v1015_v23  ;;  %v1310_v23 = vmul.f32 %v2985_v38, %v2761_v32  ;;  %v1373_v62 = vadd.f32 %v1309_v5, %v1135_v58  ;;  %v994_v61 = vadd.f32 %v962_v12, %v770_v30  ;;  %v3444_v30 = vunpack.c.h.bf16 %v3014_v22 }
 0x11f   : > { %v1315_v12 = vmul.f32 %v2983_v34, %v2786_v57 }
 0x120   : > { %v1374_v32 = vadd.f32 %v1310_v23, %v1224_v63  ;;  %v1437_v58 = vmax.f32 %v1373_v62, 0.0  ;;  %v993_v63 = vadd.f32 %v961_v44, %v769_v25  ;;  %v886_v62 = vpop.permute.xlu0 %885 }
 0x122   : > { %v1016_v7 = vpack.c.bf16 %v994_v61, %v993_v63 }
 0x123   : > { %v1136_v10 = vpop.f32.mrf.mxu0  ;;  %v1225_v48 = vpop.f32.mrf.mxu1 }
 0x124   : > { %v1137_v51 = vadd.f32 %v1136_v10, %v2979_v18  ;;  %v1226_v8 = vadd.f32 %v1225_v48, %v2981_v27  ;;  %v1438_v10 = vmax.f32 %v1374_v32, 0.0 }
 0x126   : > { %v1375_v3 = vadd.f32 %v1311_v9, %v1137_v51  ;;  %v1376_v4 = vadd.f32 %v1312_v47, %v1226_v8  ;;  %v3016_v8 = vpop.permute.xlu2 %698  ;;  %v2364_v47 = vld [vmem:[%s2751_s24 + $0x50] sm:$0xff]   ;;  %v1314_v9 = vmul.f32 %v2985_v38, %v2769_v41  ;;  %v1316_v51 = vmul.f32 %v2985_v38, %v2786_v57 }
 0x127   : > { %v2270_v49 = vunpack.c.h.bf16 %v2364_v47 }
 0x128   : > { %v1439_v5 = vmax.f32 %v1375_v3, 0.0  ;;  %v1440_v54 = vmax.f32 %v1376_v4, 0.0  ;;  %v3445_v3 = vunpack.c.l.bf16 %v3014_v22  ;;  %v891_v4 = vpop.permute.xlu1 %890  ;;  %v3041_v33 = vpop.permute.xlu0 %708 }
 0x129   : > { %v964_v32 = vmul.f32 %v3444_v30, %v891_v4 }
 0x12a   : > { %v1501_v48 = vpack.c.bf16 %v1439_v5, %v1437_v58  ;;  %v1502_v50 = vpack.c.bf16 %v1440_v54, %v1438_v10  ;;  %v2269_v54 = vunpack.c.l.bf16 %v2364_v47  ;;  %v963_v61 = vmul.f32 %v3445_v3, %v886_v62 }
 0x12b   : > { %v1139_v23 = vpop.f32.mrf.mxu0  ;;  %v1228_v6 = vpop.f32.mrf.mxu1 }
 0x12c   : > { %1673 = vmatmul.bf16.vlgmr.msra.gmra.mxu2 %v1501_v48  ;;  %1762 = vmatmul.bf16.vlgmr.msra.gmra.mxu3 %v1502_v50  ;;  %v1140_v44 = vadd.f32 %v1139_v23, %v2979_v18  ;;  %v1229_v25 = vadd.f32 %v1228_v6, %v2981_v27  ;;  %v1313_v50 = vmul.f32 %v2983_v34, %v2769_v41 }
 0x12d   : > { %v772_v23 = vmul.f32 %v2270_v49, %v3016_v8  ;;  %v771_v6 = vmul.f32 %v2269_v54, %v3009_v46  ;;  %v2365_v54 = vld [vmem:[%s2751_s24 + $0x58] sm:$0xff]  }
 0x12e   : > { %1178 = vmatmul.bf16.gmra.mxu0 %v1016_v7  ;;  %1267 = vmatmul.bf16.gmra.mxu1 %v1016_v7  ;;  %v1377_v10 = vadd.f32 %v1313_v50, %v1140_v44  ;;  %v1378_v48 = vadd.f32 %v1314_v9, %v1229_v25  ;;  %v3039_v30 = vpop.permute.xlu2 %703 }
 0x12f   : > { %v996_v47 = vadd.f32 %v964_v32, %v772_v23  ;;  %v995_v4 = vadd.f32 %v963_v61, %v771_v6  ;;  %v2274_v32 = vunpack.c.h.bf16 %v2365_v54  ;;  %v1318_v23 = vmul.f32 %v2985_v38, %v2802_v11 }
 0x130   : > { %v1441_v62 = vmax.f32 %v1377_v10, 0.0  ;;  %v1442_v3 = vmax.f32 %v1378_v48, 0.0  ;;  %v896_v61 = vpop.permute.xlu1 %895  ;;  %v2273_v48 = vunpack.c.l.bf16 %v2365_v54 }
 0x131   : > { %v1017_v49 = vpack.c.bf16 %v996_v47, %v995_v4  ;;  %v774_v4 = vmul.f32 %v2274_v32, %v3041_v33 }
 0x133   : > { %v1141_v58 = vpop.f32.mrf.mxu0  ;;  %v1230_v5 = vpop.f32.mrf.mxu1 }
 0x134   : > { %v1142_v63 = vadd.f32 %v1141_v58, %v2979_v18  ;;  %v1231_v41 = vadd.f32 %v1230_v5, %v2981_v27 }
 0x136   : > { %v1379_v7 = vadd.f32 %v1315_v12, %v1142_v63  ;;  %v1380_v57 = vadd.f32 %v1316_v51, %v1231_v41  ;;  %v3045_v12 = vld [vmem:[%s2756_s29 + $0x58] sm:$0xff]   ;;  %v1317_v41 = vmul.f32 %v2983_v34, %v2802_v11  ;;  %v901_v6 = vpop.permute.xlu2 %900 }
 0x137   : > { %v3447_v51 = vunpack.c.l.bf16 %v3045_v12  ;;  %v3449_v63 = vunpack.c.h.bf16 %v3045_v12 }
 0x138   : > { %v1443_v44 = vmax.f32 %v1379_v7, 0.0  ;;  %v1444_v25 = vmax.f32 %v1380_v57, 0.0  ;;  %v1319_v7 = vmul.f32 %v2983_v34, %v2804_v13  ;;  %v1320_v57 = vmul.f32 %v2985_v38, %v2804_v13 }
 0x139   : > { %v965_v47 = vmul.f32 %v3447_v51, %v896_v61 }
 0x13a   : > { %v1503_v50 = vpack.c.bf16 %v1443_v44, %v1441_v62  ;;  %v1504_v9 = vpack.c.bf16 %v1444_v25, %v1442_v3 }
 0x13b   : > { %v1144_v58 = vpop.f32.mrf.mxu0  ;;  %v1233_v5 = vpop.f32.mrf.mxu1 }
 0x13c   : > { %1678 = vmatmul.bf16.gmra.mxu2 %v1503_v50  ;;  %1767 = vmatmul.bf16.gmra.mxu3 %v1504_v9  ;;  %v1145_v10 = vadd.f32 %v1144_v58, %v2979_v18  ;;  %v1234_v3 = vadd.f32 %v1233_v5, %v2981_v27  ;;  %v773_v58 = vmul.f32 %v2273_v48, %v3039_v30  ;;  %v3069_v48 = vpop.permute.xlu1 %718 }
 0x13d   : > { %v966_v5 = vmul.f32 %v3449_v63, %v901_v6  ;;  %v3072_v63 = vld [vmem:[%s2756_s29 + $0x60] sm:$0xff]  }
 0x13e   : > { %1183 = vmatmul.bf16.gmra.mxu0 %v1017_v49  ;;  %1272 = vmatmul.bf16.gmra.mxu1 %v1017_v49  ;;  %v1381_v25 = vadd.f32 %v1317_v41, %v1145_v10  ;;  %v1382_v50 = vadd.f32 %v1318_v23, %v1234_v3  ;;  %v3067_v49 = vpop.permute.xlu0 %713  ;;  %v997_v32 = vadd.f32 %v965_v47, %v773_v58 }
 0x13f   : > { %v998_v61 = vadd.f32 %v966_v5, %v774_v4  ;;  %v1323_v58 = vmul.f32 %v2983_v34, %v2826_v40  ;;  %v1324_v5 = vmul.f32 %v2985_v38, %v2826_v40 }
 0x140   : > { %v1445_v51 = vmax.f32 %v1381_v25, 0.0  ;;  %v1446_v10 = vmax.f32 %v1382_v50, 0.0  ;;  %v1321_v50 = vmul.f32 %v2983_v34, %v2821_v29 }
 0x141   : > { %v1018_v6 = vpack.c.bf16 %v998_v61, %v997_v32  ;;  %v906_v61 = vpop.permute.xlu2 %905 }
 0x143   : > { %v1146_v62 = vpop.f32.mrf.mxu0  ;;  %v1235_v44 = vpop.f32.mrf.mxu1 }
 0x144   : > { %v1147_v9 = vadd.f32 %v1146_v62, %v2979_v18  ;;  %v1236_v11 = vadd.f32 %v1235_v44, %v2981_v27  ;;  %v3093_v40 = vpop.permute.xlu1 %723 }
 0x146   : > { %v1383_v13 = vadd.f32 %v1319_v7, %v1147_v9  ;;  %v1384_v54 = vadd.f32 %v1320_v57, %v1236_v11  ;;  %v2366_v7 = vld [vmem:[%s2751_s24 + $0x60] sm:$0xff]   ;;  %v3450_v57 = vunpack.c.h.bf16 %v3072_v63  ;;  %v911_v47 = vpop.permute.xlu0 %910  ;;  %v1322_v9 = vmul.f32 %v2985_v38, %v2821_v29 }
 0x147   : > { %v2278_v25 = vunpack.c.h.bf16 %v2366_v7  ;;  %v2277_v11 = vunpack.c.l.bf16 %v2366_v7 }
 0x148   : > { %v1447_v3 = vmax.f32 %v1383_v13, 0.0  ;;  %v1448_v41 = vmax.f32 %v1384_v54, 0.0  ;;  %v3455_v13 = vunpack.c.l.bf16 %v3072_v63  ;;  %v968_v54 = vmul.f32 %v3450_v57, %v911_v47 }
 0x14a   : > { %v1505_v23 = vpack.c.bf16 %v1447_v3, %v1445_v51  ;;  %v1506_v62 = vpack.c.bf16 %v1448_v41, %v1446_v10  ;;  %v967_v7 = vmul.f32 %v3455_v13, %v906_v61  ;;  %v3454_v61 = vunpack.c.l.bf16 %v3098_v60 }
 0x14b   : > { %v1149_v44 = vpop.f32.mrf.mxu0  ;;  %v1238_v16 = vpop.f32.mrf.mxu1 }
 0x14c   : > { %1683 = vmatmul.bf16.gmra.mxu2 %v1505_v23  ;;  %1772 = vmatmul.bf16.gmra.mxu3 %v1506_v62  ;;  %v1150_v4 = vadd.f32 %v1149_v44, %v2979_v18  ;;  %v1239_v51 = vadd.f32 %v1238_v16, %v2981_v27  ;;  %v776_v23 = vmul.f32 %v2278_v25, %v3069_v48 }
 0x14d   : > { %v775_v62 = vmul.f32 %v2277_v11, %v3067_v49 }
 0x14e   : > { %1188 = vmatmul.bf16.gmra.mxu0 %v1018_v6  ;;  %1277 = vmatmul.bf16.gmra.mxu1 %v1018_v6  ;;  %v1385_v10 = vadd.f32 %v1321_v50, %v1150_v4  ;;  %v1386_v3 = vadd.f32 %v1322_v9, %v1239_v51  ;;  %v1000_v47 = vadd.f32 %v968_v54, %v776_v23  ;;  %v3453_v54 = vunpack.c.h.bf16 %v3098_v60 }
 0x150   : > { %v1449_v4 = vmax.f32 %v1385_v10, 0.0  ;;  %v1450_v51 = vmax.f32 %v1386_v3, 0.0  ;;  %v921_v10 = vpop.permute.xlu1 %920  ;;  %v916_v3 = vpop.permute.xlu0 %915 }
 0x153   : > { %v1151_v16 = vpop.f32.mrf.mxu0  ;;  %v1240_v32 = vpop.f32.mrf.mxu1 }
 0x154   : > { %v1152_v41 = vadd.f32 %v1151_v16, %v2979_v18  ;;  %v1241_v29 = vadd.f32 %v1240_v32, %v2981_v27  ;;  %v999_v16 = vadd.f32 %v967_v7, %v775_v62  ;;  %v1328_v7 = vmul.f32 %v2985_v38, %v2846_v1 }
 0x156   : > { %v1387_v44 = vadd.f32 %v1323_v58, %v1152_v41  ;;  %v1388_v6 = vadd.f32 %v1324_v5, %v1241_v29  ;;  %v1019_v11 = vpack.c.bf16 %v1000_v47, %v999_v16  ;;  %v3100_v58 = vpop.permute.xlu2 %728  ;;  %v2367_v5 = vld [vmem:[%s2751_s24 + $0x68] sm:$0xff]   ;;  %v970_v47 = vmul.f32 %v3453_v54, %v921_v10 }
 0x157   : > { %v2282_v23 = vunpack.c.h.bf16 %v2367_v5  ;;  %v2281_v62 = vunpack.c.l.bf16 %v2367_v5 }
 0x158   : > { %v1451_v50 = vmax.f32 %v1387_v44, 0.0  ;;  %v1452_v9 = vmax.f32 %v1388_v6, 0.0  ;;  %v1326_v44 = vmul.f32 %v2985_v38, %v2839_v56  ;;  %v1327_v6 = vmul.f32 %v2983_v34, %v2846_v1  ;;  %v3125_v13 = vpop.permute.xlu0 %738 }
 0x15a   : > { %v1507_v32 = vpack.c.bf16 %v1451_v50, %v1449_v4  ;;  %v1508_v57 = vpack.c.bf16 %v1452_v9, %v1450_v51 }
 0x15b   : > { %v1154_v25 = vpop.f32.mrf.mxu0  ;;  %v1243_v59 = vpop.f32.mrf.mxu1 }
 0x15c   : > { %1688 = vmatmul.bf16.gmra.mxu2 %v1507_v32  ;;  %1777 = vmatmul.bf16.gmra.mxu3 %v1508_v57  ;;  %v1155_v41 = vadd.f32 %v1154_v25, %v2979_v18  ;;  %v1244_v29 = vadd.f32 %v1243_v59, %v2981_v27  ;;  %v1325_v57 = vmul.f32 %v2983_v34, %v2839_v56 }
 0x15d   : > { %v969_v59 = vmul.f32 %v3454_v61, %v916_v3  ;;  %v778_v32 = vmul.f32 %v2282_v23, %v3100_v58  ;;  %v777_v25 = vmul.f32 %v2281_v62, %v3093_v40  ;;  %v2368_v62 = vld [vmem:[%s2751_s24 + $0x70] sm:$0xff]  }
 0x15e   : > { %1193 = vmatmul.bf16.gmra.mxu0 %v1019_v11  ;;  %1282 = vmatmul.bf16.gmra.mxu1 %v1019_v11  ;;  %v1389_v50 = vadd.f32 %v1325_v57, %v1155_v41  ;;  %v1390_v9 = vadd.f32 %v1326_v44, %v1244_v29  ;;  %v3123_v54 = vpop.permute.xlu2 %733 }
 0x15f   : > { %v1002_v5 = vadd.f32 %v970_v47, %v778_v32  ;;  %v1001_v10 = vadd.f32 %v969_v59, %v777_v25  ;;  %v2286_v47 = vunpack.c.h.bf16 %v2368_v62  ;;  %v926_v59 = vpop.permute.xlu1 %925  ;;  %v1330_v32 = vmul.f32 %v2985_v38, %v2857_v19 }
 0x160   : > { %v1453_v3 = vmax.f32 %v1389_v50, 0.0  ;;  %v1454_v61 = vmax.f32 %v1390_v9, 0.0  ;;  %v2285_v9 = vunpack.c.l.bf16 %v2368_v62 }
 0x161   : > { %v1020_v23 = vpack.c.bf16 %v1002_v5, %v1001_v10  ;;  %v780_v10 = vmul.f32 %v2286_v47, %v3125_v13 }
 0x163   : > { %v1156_v4 = vpop.f32.mrf.mxu0  ;;  %v1245_v51 = vpop.f32.mrf.mxu1 }
 0x164   : > { %v1157_v16 = vadd.f32 %v1156_v4, %v2979_v18  ;;  %v1246_v56 = vadd.f32 %v1245_v51, %v2981_v27 }
 0x166   : > { %v1391_v11 = vadd.f32 %v1327_v6, %v1157_v16  ;;  %v1392_v1 = vadd.f32 %v1328_v7, %v1246_v56  ;;  %v3129_v6 = vld [vmem:[%s2756_s29 + $0x70] sm:$0xff]   ;;  %v1329_v56 = vmul.f32 %v2983_v34, %v2857_v19  ;;  %v931_v25 = vpop.permute.xlu2 %930 }
 0x167   : > { %3467 = vst [vmem:[#allocation5_spill] sm:$0xff] %v3129_v6  ;;  %v3456_v7 = vunpack.c.l.bf16 %v3129_v6  ;;  %v3458_v16 = vunpack.c.h.bf16 %v3129_v6 }
 0x168   : > { %v1455_v41 = vmax.f32 %v1391_v11, 0.0  ;;  %v1456_v29 = vmax.f32 %v1392_v1, 0.0  ;;  %v1331_v11 = vmul.f32 %v2983_v34, %v2859_v21  ;;  %v1332_v1 = vmul.f32 %v2985_v38, %v2859_v21 }
 0x169   : > { %v971_v5 = vmul.f32 %v3456_v7, %v926_v59 }
 0x16a   : > { %v1509_v57 = vpack.c.bf16 %v1455_v41, %v1453_v3  ;;  %v1510_v44 = vpack.c.bf16 %v1456_v29, %v1454_v61 }
 0x16b   : > { %v1159_v4 = vpop.f32.mrf.mxu0  ;;  %v1248_v51 = vpop.f32.mrf.mxu1 }
 0x16c   : > { %1693 = vmatmul.bf16.gmra.mxu2 %v1509_v57  ;;  %1782 = vmatmul.bf16.gmra.mxu3 %v1510_v44  ;;  %v1160_v50 = vadd.f32 %v1159_v4, %v2979_v18  ;;  %v1249_v61 = vadd.f32 %v1248_v51, %v2981_v27  ;;  %v779_v4 = vmul.f32 %v2285_v9, %v3123_v54 }
 0x16d   : > { %v972_v51 = vmul.f32 %v3458_v16, %v931_v25  ;;  %v3154_v25 = vld [vmem:[%s2756_s29 + $0x78] sm:$0xff]  }
 0x16e   : > { %1198 = vmatmul.bf16.gmra.mxu0 %v1020_v23  ;;  %1287 = vmatmul.bf16.gmra.mxu1 %v1020_v23  ;;  %v1393_v29 = vadd.f32 %v1329_v56, %v1160_v50  ;;  %v1394_v57 = vadd.f32 %v1330_v32, %v1249_v61  ;;  %v3151_v23 = vpop.permute.xlu0 %743  ;;  %v1003_v47 = vadd.f32 %v971_v5, %v779_v4  ;;  %v2369_v16 = vld [vmem:[%s2751_s24 + $0x78] sm:$0xff]  }
 0x16f   : > { %v1004_v59 = vadd.f32 %v972_v51, %v780_v10  ;;  %v1335_v4 = vmul.f32 %v2983_v34, %v2881_v52  ;;  %v1336_v51 = vmul.f32 %v2985_v38, %v2881_v52 }
 0x170   : > { %v1457_v7 = vmax.f32 %v1393_v29, 0.0  ;;  %v1458_v50 = vmax.f32 %v1394_v57, 0.0  ;;  %v2290_v29 = vunpack.c.h.bf16 %v2369_v16  ;;  %v1334_v57 = vmul.f32 %v2985_v38, %v2873_v43 }
 0x171   : > { %v1021_v9 = vpack.c.bf16 %v1004_v59, %v1003_v47  ;;  %v936_v59 = vpop.permute.xlu2 %935 }
 0x173   : > { %v1161_v3 = vpop.f32.mrf.mxu0  ;;  %v1250_v41 = vpop.f32.mrf.mxu1 }
 0x174   : > { %v1162_v44 = vadd.f32 %v1161_v3, %v2979_v18  ;;  %v1251_v19 = vadd.f32 %v1250_v41, %v2981_v27 }
 0x176   : > { %v1395_v21 = vadd.f32 %v1331_v11, %v1162_v44  ;;  %v1396_v62 = vadd.f32 %v1332_v1, %v1251_v19  ;;  %v3459_v11 = vunpack.c.h.bf16 %v3154_v25  ;;  %v941_v1 = vpop.permute.xlu0 %940  ;;  %v3164_v44 = vpop.permute.xlu1 %748  ;;  %v2289_v19 = vunpack.c.l.bf16 %v2369_v16 }
 0x178   : > { %v1459_v61 = vmax.f32 %v1395_v21, 0.0  ;;  %v1460_v56 = vmax.f32 %v1396_v62, 0.0  ;;  %v2353_v21 = vunpack.c.l.bf16 %v3154_v25 }
 0x17a   : > { %v1511_v32 = vpack.c.bf16 %v1459_v61, %v1457_v7  ;;  %v1512_v3 = vpack.c.bf16 %v1460_v56, %v1458_v50  ;;  %v1333_v7 = vmul.f32 %v2983_v34, %v2873_v43  ;;  %v782_v56 = vmul.f32 %v2290_v29, %v3164_v44 }
 0x17b   : > { %v1164_v41 = vpop.f32.mrf.mxu0  ;;  %v1253_v39 = vpop.f32.mrf.mxu1 }
 0x17c   : > { %1698 = vmatmul.bf16.gmra.mxu2 %v1511_v32  ;;  %1787 = vmatmul.bf16.gmra.mxu3 %v1512_v3  ;;  %v1165_v5 = vadd.f32 %v1164_v41, %v2979_v18  ;;  %v1254_v10 = vadd.f32 %v1253_v39, %v2981_v27  ;;  %v974_v39 = vmul.f32 %v3459_v11, %v941_v1 }
 0x17d   : > { %v781_v32 = vmul.f32 %v2289_v19, %v3151_v23  ;;  %v973_v41 = vmul.f32 %v2353_v21, %v936_v59 }
 0x17e   : > { %1203 = vmatmul.bf16.gmra.mxu0 %v1021_v9  ;;  %1292 = vmatmul.bf16.gmra.mxu1 %v1021_v9  ;;  %v1397_v50 = vadd.f32 %v1333_v7, %v1165_v5  ;;  %v1398_v61 = vadd.f32 %v1334_v57, %v1254_v10  ;;  %v1006_v9 = vadd.f32 %v974_v39, %v782_v56 }
 0x17f   : > { %v1005_v5 = vadd.f32 %v973_v41, %v781_v32 }
 0x180   : > { %v1461_v1 = vmax.f32 %v1397_v50, 0.0  ;;  %v1462_v11 = vmax.f32 %v1398_v61, 0.0 }
 0x183   : > { %v1166_v62 = vpop.f32.mrf.mxu0  ;;  %v1255_v47 = vpop.f32.mrf.mxu1 }
 0x184   : > { %v1167_v43 = vadd.f32 %v1166_v62, %v2979_v18  ;;  %v1256_v16 = vadd.f32 %v1255_v47, %v2981_v27  ;;  %v1022_v47 = vpack.c.bf16 %v1006_v9, %v1005_v5 }
 0x186   : > { %v1399_v3 = vadd.f32 %v1335_v4, %v1167_v43  ;;  %v1400_v52 = vadd.f32 %v1336_v51, %v1256_v16  ;;  %v1337_v4 = vmul.f32 %v2983_v34, %v2905_v17  ;;  %v1338_v51 = vmul.f32 %v2985_v38, %v2905_v17 }
 0x188   : > { %v1463_v36 = vmax.f32 %v1399_v3, 0.0  ;;  %v1464_v6 = vmax.f32 %v1400_v52, 0.0 }
 0x18a   : > { %v1513_v10 = vpack.c.bf16 %v1463_v36, %v1461_v1  ;;  %v1514_v7 = vpack.c.bf16 %v1464_v6, %v1462_v11  ;;  %v1339_v36 = vmul.f32 %v2983_v34, %v2924_v37  ;;  %v1340_v6 = vmul.f32 %v2985_v38, %v2924_v37 }
 0x18b   : > { %v1169_v57 = vpop.f32.mrf.mxu0  ;;  %v1258_v62 = vpop.f32.mrf.mxu1 }
 0x18c   : > { %1703 = vmatmul.bf16.gmra.mxu2 %v1513_v10  ;;  %1792 = vmatmul.bf16.gmra.mxu3 %v1514_v7  ;;  %v1170_v29 = vadd.f32 %v1169_v57, %v2979_v18  ;;  %v1259_v19 = vadd.f32 %v1258_v62, %v2981_v27  ;;  %v1341_v7 = vmul.f32 %v2983_v34, %v2953_v20 }
 0x18d   : > { %v1342_v57 = vmul.f32 %v2985_v38, %v2953_v20  ;;  %v1343_v62 = vmul.f32 %v2983_v34, %v2955_v26 }
 0x18e   : > { %1208 = vmatmul.bf16.gmra.mxu0 %v1022_v47  ;;  %1297 = vmatmul.bf16.gmra.mxu1 %v1022_v47  ;;  %v1401_v59 = vadd.f32 %v1337_v4, %v1170_v29  ;;  %v1402_v50 = vadd.f32 %v1338_v51, %v1259_v19  ;;  %v1344_v47 = vmul.f32 %v2985_v38, %v2955_v26  ;;  %v3206_v26 = vld [vmem:[%s3428_s8] ss:$0 sm:$0xff] }
 0x190   : > { %v1465_v32 = vmax.f32 %v1401_v59, 0.0  ;;  %v1466_v3 = vmax.f32 %v1402_v50, 0.0 }
 0x193   : > { %v1171_v11 = vpop.f32.mrf.mxu0  ;;  %v1260_v39 = vpop.f32.mrf.mxu1 }
 0x194   : > { %v1172_v61 = vadd.f32 %v1171_v11, %v2979_v18  ;;  %v1261_v43 = vadd.f32 %v1260_v39, %v2981_v27 }
 0x196   : > { %v1403_v16 = vadd.f32 %v1339_v36, %v1172_v61  ;;  %v1404_v56 = vadd.f32 %v1340_v6, %v1261_v43 }
 0x198   : > { %v1467_v52 = vmax.f32 %v1403_v16, 0.0  ;;  %v1468_v17 = vmax.f32 %v1404_v56, 0.0 }
 0x19a   : > { %v1515_v41 = vpack.c.bf16 %v1467_v52, %v1465_v32  ;;  %v1516_v9 = vpack.c.bf16 %v1468_v17, %v1466_v3 }
 0x19b   : > { %v1174_v1 = vpop.f32.mrf.mxu0  ;;  %v1263_v5 = vpop.f32.mrf.mxu1 }
 0x19c   : > { %1708 = vmatmul.bf16.gmra.mxu2 %v1515_v41  ;;  %1797 = vmatmul.bf16.gmra.mxu3 %v1516_v9  ;;  %v1175_v37 = vadd.f32 %v1174_v1, %v2979_v18  ;;  %v1264_v10 = vadd.f32 %v1263_v5, %v2981_v27  ;;  %v1345_v1 = vmul.f32 %v2983_v34, %v2969_v2 }
 0x19d   : > { %v1346_v5 = vmul.f32 %v2985_v38, %v2969_v2 }
 0x19e   : > { %v1405_v4 = vadd.f32 %v1341_v7, %v1175_v37  ;;  %v1406_v51 = vadd.f32 %v1342_v57, %v1264_v10  ;;  %v1347_v10 = vmul.f32 %v2983_v34, %v2977_v14 }
 0x1a0   : > { %v1469_v59 = vmax.f32 %v1405_v4, 0.0  ;;  %v1470_v50 = vmax.f32 %v1406_v51, 0.0 }
 0x1a3   : > { %v1176_v29 = vpop.f32.mrf.mxu0  ;;  %v1265_v19 = vpop.f32.mrf.mxu1 }
 0x1a4   : > { %v1177_v36 = vadd.f32 %v1176_v29, %v2979_v18  ;;  %v1266_v6 = vadd.f32 %v1265_v19, %v2981_v27 }
 0x1a6   : > { %v1407_v11 = vadd.f32 %v1343_v62, %v1177_v36  ;;  %v1408_v39 = vadd.f32 %v1344_v47, %v1266_v6  ;;  %v1348_v47 = vmul.f32 %v2985_v38, %v2977_v14 }
 0x1a8   : > { %v1471_v61 = vmax.f32 %v1407_v11, 0.0  ;;  %v1472_v20 = vmax.f32 %v1408_v39, 0.0 }
 0x1aa   : > { %v1517_v43 = vpack.c.bf16 %v1471_v61, %v1469_v59  ;;  %v1518_v16 = vpack.c.bf16 %v1472_v20, %v1470_v50  ;;  %v3468_v20 = vunpack.c.l.bf16 %v2759_v31 }
 0x1ab   : > { %v1179_v56 = vpop.f32.mrf.mxu0  ;;  %v1268_v32 = vpop.f32.mrf.mxu1 }
 0x1ac   : > { %1713 = vmatmul.bf16.gmra.mxu2 %v1517_v43  ;;  %1802 = vmatmul.bf16.gmra.mxu3 %v1518_v16  ;;  %v1180_v3 = vadd.f32 %v1179_v56, %v2979_v18  ;;  %v1269_v17 = vadd.f32 %v1268_v32, %v2981_v27 }
 0x1ae   : > { %v1409_v7 = vadd.f32 %v1345_v1, %v1180_v3  ;;  %v1410_v29 = vadd.f32 %v1346_v5, %v1269_v17 }
 0x1af   : > { %v1674_v52 = vpop.f32.mrf.mxu2  ;;  %v1763_v9 = vpop.f32.mrf.mxu3 }
 0x1b0   : > { %v1675_v41 = vadd.f32 %v3206_v26, %v1674_v52  ;;  %v1473_v6 = vmax.f32 %v1409_v7, 0.0  ;;  %v1474_v2 = vmax.f32 %v1410_v29, 0.0  ;;  %v3469_v52 = vunpack.c.h.bf16 %v2759_v31 }
 0x1b1   : > { %v1350_v31 = vmul.f32 %v2985_v38, %v3009_v46  ;;  %v1351_v29 = vmul.f32 %v2983_v34, %v3016_v8 }
 0x1b2   : > { %v1764_v37 = vadd.f32 %v1763_v9, %v1675_v41 }
 0x1b3   : > { %v1181_v57 = vpop.f32.mrf.mxu0  ;;  %v1270_v62 = vpop.f32.mrf.mxu1 }
 0x1b4   : > { %v1182_v19 = vadd.f32 %v1181_v57, %v2979_v18  ;;  %v1271_v4 = vadd.f32 %v1270_v62, %v2981_v27  ;;  %v1843_v43 = vsub.f32 %v1764_v37, %v3468_v20  ;;  %v1349_v62 = vmul.f32 %v2983_v34, %v3009_v46 }
 0x1b6   : > { %v1411_v51 = vadd.f32 %v1347_v10, %v1182_v19  ;;  %v1412_v36 = vadd.f32 %v1348_v47, %v1271_v4  ;;  %v1875_v41 = vand.u32 2147483647, %v1843_v43 }
 0x1b7   : > { %v1676_v11 = vpop.f32.mrf.mxu2  ;;  %v1765_v61 = vpop.f32.mrf.mxu3 }
 0x1b8   : > { %v1475_v39 = vmax.f32 %v1411_v51, 0.0  ;;  %v1476_v59 = vmax.f32 %v1412_v36, 0.0  ;;  %v1677_v50 = vadd.f32 %v3206_v26, %v1676_v11  ;;  %v3470_v11 = vunpack.c.l.bf16 %v2784_v55 }
 0x1ba   : > { %v1766_v16 = vadd.f32 %v1765_v61, %v1677_v50  ;;  %v1519_v14 = vpack.c.bf16 %v1475_v39, %v1473_v6  ;;  %v1520_v56 = vpack.c.bf16 %v1476_v59, %v1474_v2  ;;  %v1352_v6 = vmul.f32 %v2985_v38, %v3016_v8 }
 0x1bb   : > { %v1184_v32 = vpop.f32.mrf.mxu0  ;;  %v1273_v3 = vpop.f32.mrf.mxu1 }
 0x1bc   : > { %v1844_v17 = vsub.f32 %v1766_v16, %v3469_v52  ;;  %1718 = vmatmul.bf16.gmra.mxu2 %v1519_v14  ;;  %1807 = vmatmul.bf16.gmra.mxu3 %v1520_v56  ;;  %v1185_v1 = vadd.f32 %v1184_v32, %v2979_v18  ;;  %v1274_v5 = vadd.f32 %v1273_v3, %v2981_v27 }
 0x1be   : > { %v1876_v9 = vand.u32 2147483647, %v1844_v17  ;;  %v1413_v19 = vadd.f32 %v1349_v62, %v1185_v1  ;;  %v1414_v4 = vadd.f32 %v1350_v31, %v1274_v5  ;;  %v3471_v5 = vunpack.c.h.bf16 %v2784_v55 }
 0x1bf   : > { %v1679_v10 = vpop.f32.mrf.mxu2  ;;  %v1768_v57 = vpop.f32.mrf.mxu3 }
 0x1c0   : > { %v1907_v7 = vadd.f32 %v1876_v9, %v1875_v41  ;;  %v1680_v37 = vadd.f32 %v3206_v26, %v1679_v10  ;;  %v1477_v20 = vmax.f32 %v1413_v19, 0.0  ;;  %v1478_v43 = vmax.f32 %v1414_v4, 0.0 }
 0x1c1   : > { %v1353_v19 = vmul.f32 %v2983_v34, %v3039_v30  ;;  %v1354_v4 = vmul.f32 %v2985_v38, %v3039_v30 }
 0x1c2   : > { %v1769_v47 = vadd.f32 %v1768_v57, %v1680_v37 }
 0x1c3   : > { %v1186_v51 = vpop.f32.mrf.mxu0  ;;  %v1275_v36 = vpop.f32.mrf.mxu1 }
 0x1c4   : > { %v1845_v2 = vsub.f32 %v1769_v47, %v3470_v11  ;;  %v1187_v39 = vadd.f32 %v1186_v51, %v2979_v18  ;;  %v1276_v59 = vadd.f32 %v1275_v36, %v2981_v27  ;;  %v1355_v51 = vmul.f32 %v2983_v34, %v3041_v33 }
 0x1c6   : > { %v1877_v50 = vand.u32 2147483647, %v1845_v2  ;;  %v1415_v46 = vadd.f32 %v1351_v29, %v1187_v39  ;;  %v1416_v61 = vadd.f32 %v1352_v6, %v1276_v59  ;;  %v1356_v39 = vmul.f32 %v2985_v38, %v3041_v33 }
 0x1c7   : > { %v1681_v16 = vpop.f32.mrf.mxu2  ;;  %v1770_v52 = vpop.f32.mrf.mxu3  ;;  %v3472_v59 = vunpack.c.l.bf16 %v2808_v15 }
 0x1c8   : > { %v1908_v14 = vadd.f32 %v1907_v7, %v1877_v50  ;;  %v1479_v56 = vmax.f32 %v1415_v46, 0.0  ;;  %v1480_v32 = vmax.f32 %v1416_v61, 0.0  ;;  %v1682_v3 = vadd.f32 %v3206_v26, %v1681_v16 }
 0x1ca   : > { %v1771_v8 = vadd.f32 %v1770_v52, %v1682_v3  ;;  %v1521_v17 = vpack.c.bf16 %v1479_v56, %v1477_v20  ;;  %v1522_v41 = vpack.c.bf16 %v1480_v32, %v1478_v43 }
 0x1cb   : > { %v1189_v9 = vpop.f32.mrf.mxu0  ;;  %v1278_v1 = vpop.f32.mrf.mxu1 }
 0x1cc   : > { %v1846_v10 = vsub.f32 %v1771_v8, %v3471_v5  ;;  %1723 = vmatmul.bf16.gmra.mxu2 %v1521_v17  ;;  %1812 = vmatmul.bf16.gmra.mxu3 %v1522_v41  ;;  %v1190_v57 = vadd.f32 %v1189_v9, %v2979_v18  ;;  %v1279_v7 = vadd.f32 %v1278_v1, %v2981_v27 }
 0x1ce   : > { %v1878_v37 = vand.u32 2147483647, %v1846_v10  ;;  %v1417_v36 = vadd.f32 %v1353_v19, %v1190_v57  ;;  %v1418_v6 = vadd.f32 %v1354_v4, %v1279_v7  ;;  %v3473_v10 = vunpack.c.h.bf16 %v2808_v15 }
 0x1cf   : > { %v1684_v62 = vpop.f32.mrf.mxu2  ;;  %v1773_v29 = vpop.f32.mrf.mxu3  ;;  %v1357_v4 = vmul.f32 %v2983_v34, %v3067_v49 }
 0x1d0   : > { %v1909_v31 = vadd.f32 %v1908_v14, %v1878_v37  ;;  %v1685_v47 = vadd.f32 %v3206_v26, %v1684_v62  ;;  %v1481_v16 = vmax.f32 %v1417_v36, 0.0  ;;  %v1482_v14 = vmax.f32 %v1418_v6, 0.0 }
 0x1d2   : > { %v1774_v55 = vadd.f32 %v1773_v29, %v1685_v47 }
 0x1d3   : > { %v1191_v11 = vpop.f32.mrf.mxu0  ;;  %v1280_v2 = vpop.f32.mrf.mxu1 }
 0x1d4   : > { %v1847_v50 = vsub.f32 %v1774_v55, %v3472_v59  ;;  %v1192_v46 = vadd.f32 %v1191_v11, %v2979_v18  ;;  %v1281_v61 = vadd.f32 %v1280_v2, %v2981_v27  ;;  %v1358_v55 = vmul.f32 %v2985_v38, %v3067_v49 }
 0x1d5   : > { %v3474_v59 = vunpack.c.l.bf16 %v2829_v42 }
 0x1d6   : > { %v1879_v20 = vand.u32 2147483647, %v1847_v50  ;;  %v1419_v30 = vadd.f32 %v1355_v51, %v1192_v46  ;;  %v1420_v43 = vadd.f32 %v1356_v39, %v1281_v61  ;;  %v1359_v51 = vmul.f32 %v2983_v34, %v3069_v48 }
 0x1d7   : > { %v1686_v56 = vpop.f32.mrf.mxu2  ;;  %v1775_v17 = vpop.f32.mrf.mxu3  ;;  %v1360_v39 = vmul.f32 %v2985_v38, %v3069_v48 }
 0x1d8   : > { %v1910_v32 = vadd.f32 %v1909_v31, %v1879_v20  ;;  %v1483_v3 = vmax.f32 %v1419_v30, 0.0  ;;  %v1484_v52 = vmax.f32 %v1420_v43, 0.0  ;;  %v1687_v8 = vadd.f32 %v3206_v26, %v1686_v56 }
 0x1da   : > { %v1776_v33 = vadd.f32 %v1775_v17, %v1687_v8  ;;  %v1523_v41 = vpack.c.bf16 %v1483_v3, %v1481_v16  ;;  %v1524_v9 = vpack.c.bf16 %v1484_v52, %v1482_v14 }
 0x1db   : > { %v1194_v1 = vpop.f32.mrf.mxu0  ;;  %v1283_v5 = vpop.f32.mrf.mxu1 }
 0x1dc   : > { %v1848_v37 = vsub.f32 %v1776_v33, %v3473_v10  ;;  %1728 = vmatmul.bf16.gmra.mxu2 %v1523_v41  ;;  %1817 = vmatmul.bf16.gmra.mxu3 %v1524_v9  ;;  %v1195_v7 = vadd.f32 %v1194_v1, %v2979_v18  ;;  %v1284_v62 = vadd.f32 %v1283_v5, %v2981_v27  ;;  %v3475_v1 = vunpack.c.h.bf16 %v2829_v42 }
 0x1de   : > { %v1880_v57 = vand.u32 2147483647, %v1848_v37  ;;  %v1421_v36 = vadd.f32 %v1357_v4, %v1195_v7  ;;  %v1422_v6 = vadd.f32 %v1358_v55, %v1284_v62  ;;  %v1363_v4 = vmul.f32 %v2983_v34, %v3100_v58 }
 0x1df   : > { %v1689_v31 = vpop.f32.mrf.mxu2  ;;  %v1778_v19 = vpop.f32.mrf.mxu3 }
 0x1e0   : > { %v1911_v47 = vadd.f32 %v1910_v32, %v1880_v57  ;;  %v1690_v29 = vadd.f32 %v3206_v26, %v1689_v31  ;;  %v1485_v43 = vmax.f32 %v1421_v36, 0.0  ;;  %v1486_v16 = vmax.f32 %v1422_v6, 0.0 }
 0x1e1   : > { %v1364_v6 = vmul.f32 %v2985_v38, %v3100_v58 }
 0x1e2   : > { %v1779_v15 = vadd.f32 %v1778_v19, %v1690_v29  ;;  %v1361_v29 = vmul.f32 %v2983_v34, %v3093_v40  ;;  %v1362_v19 = vmul.f32 %v2985_v38, %v3093_v40 }
 0x1e3   : > { %v1196_v11 = vpop.f32.mrf.mxu0  ;;  %v1285_v2 = vpop.f32.mrf.mxu1 }
 0x1e4   : > { %v1849_v50 = vsub.f32 %v1779_v15, %v3474_v59  ;;  %v1197_v46 = vadd.f32 %v1196_v11, %v2979_v18  ;;  %v1286_v61 = vadd.f32 %v1285_v2, %v2981_v27  ;;  %v3476_v11 = vunpack.c.l.bf16 %v2844_v0 }
 0x1e6   : > { %v1881_v20 = vand.u32 2147483647, %v1849_v50  ;;  %v1423_v49 = vadd.f32 %v1359_v51, %v1197_v46  ;;  %v1424_v30 = vadd.f32 %v1360_v39, %v1286_v61 }
 0x1e7   : > { %v1691_v14 = vpop.f32.mrf.mxu2  ;;  %v1780_v8 = vpop.f32.mrf.mxu3 }
 0x1e8   : > { %v1912_v56 = vadd.f32 %v1911_v47, %v1881_v20  ;;  %v1487_v32 = vmax.f32 %v1423_v49, 0.0  ;;  %v1488_v3 = vmax.f32 %v1424_v30, 0.0  ;;  %v1692_v52 = vadd.f32 %v3206_v26, %v1691_v14 }
 0x1ea   : > { %v1781_v48 = vadd.f32 %v1780_v8, %v1692_v52  ;;  %v1525_v17 = vpack.c.bf16 %v1487_v32, %v1485_v43  ;;  %v1526_v33 = vpack.c.bf16 %v1488_v3, %v1486_v16 }
 0x1eb   : > { %v1199_v41 = vpop.f32.mrf.mxu0  ;;  %v1288_v9 = vpop.f32.mrf.mxu1 }
 0x1ec   : > { %v1850_v5 = vsub.f32 %v1781_v48, %v3475_v1  ;;  %1733 = vmatmul.bf16.gmra.mxu2 %v1525_v17  ;;  %1822 = vmatmul.bf16.gmra.mxu3 %v1526_v33  ;;  %v1200_v37 = vadd.f32 %v1199_v41, %v2979_v18  ;;  %v1289_v57 = vadd.f32 %v1288_v9, %v2981_v27  ;;  %v3477_v48 = vunpack.c.h.bf16 %v2844_v0 }
 0x1ee   : > { %v1882_v10 = vand.u32 2147483647, %v1850_v5  ;;  %v1425_v55 = vadd.f32 %v1361_v29, %v1200_v37  ;;  %v1426_v15 = vadd.f32 %v1362_v19, %v1289_v57  ;;  %v1365_v57 = vmul.f32 %v2983_v34, %v3123_v54 }
 0x1ef   : > { %v1694_v7 = vpop.f32.mrf.mxu2  ;;  %v1783_v47 = vpop.f32.mrf.mxu3 }
 0x1f0   : > { %v1913_v62 = vadd.f32 %v1912_v56, %v1882_v10  ;;  %v1695_v31 = vadd.f32 %v3206_v26, %v1694_v7  ;;  %v1489_v61 = vmax.f32 %v1425_v55, 0.0  ;;  %v1490_v20 = vmax.f32 %v1426_v15, 0.0 }
 0x1f1   : > { %v1366_v7 = vmul.f32 %v2985_v38, %v3123_v54 }
 0x1f2   : > { %v1784_v42 = vadd.f32 %v1783_v47, %v1695_v31 }
 0x1f3   : > { %v1201_v51 = vpop.f32.mrf.mxu0  ;;  %v1290_v36 = vpop.f32.mrf.mxu1 }
 0x1f4   : > { %v1851_v2 = vsub.f32 %v1784_v42, %v3476_v11  ;;  %v1202_v39 = vadd.f32 %v1201_v51, %v2979_v18  ;;  %v1291_v59 = vadd.f32 %v1290_v36, %v2981_v27  ;;  %v1368_v42 = vmul.f32 %v2985_v38, %v3125_v13 }
 0x1f6   : > { %v1883_v50 = vand.u32 2147483647, %v1851_v2  ;;  %v1427_v40 = vadd.f32 %v1363_v4, %v1202_v39  ;;  %v1428_v46 = vadd.f32 %v1364_v6, %v1291_v59  ;;  %v3478_v4 = vunpack.c.l.bf16 %v2863_v24 }
 0x1f7   : > { %v1696_v49 = vpop.f32.mrf.mxu2  ;;  %v1785_v56 = vpop.f32.mrf.mxu3 }
 0x1f8   : > { %v1914_v30 = vadd.f32 %v1913_v62, %v1883_v50  ;;  %v1491_v43 = vmax.f32 %v1427_v40, 0.0  ;;  %v1492_v16 = vmax.f32 %v1428_v46, 0.0  ;;  %v1697_v14 = vadd.f32 %v3206_v26, %v1696_v49 }
 0x1f9   : > { %v1367_v62 = vmul.f32 %v2983_v34, %v3125_v13 }
 0x1fa   : > { %v1786_v58 = vadd.f32 %v1785_v56, %v1697_v14  ;;  %v1527_v32 = vpack.c.bf16 %v1491_v43, %v1489_v61  ;;  %v1528_v3 = vpack.c.bf16 %v1492_v16, %v1490_v20  ;;  %v3479_v16 = vunpack.c.h.bf16 %v2863_v24 }
 0x1fb   : > { %v1204_v52 = vpop.f32.mrf.mxu0  ;;  %v1293_v8 = vpop.f32.mrf.mxu1 }
 0x1fc   : > { %v1852_v17 = vsub.f32 %v1786_v58, %v3477_v48  ;;  %1738 = vmatmul.bf16.gmra.mxu2 %v1527_v32  ;;  %1827 = vmatmul.bf16.gmra.mxu3 %v1528_v3  ;;  %v1205_v41 = vadd.f32 %v1204_v52, %v2979_v18  ;;  %v1294_v9 = vadd.f32 %v1293_v8, %v2981_v27 }
 0x1fe   : > { %v1884_v33 = vand.u32 2147483647, %v1852_v17  ;;  %v1429_v31 = vadd.f32 %v1365_v57, %v1205_v41  ;;  %v1430_v47 = vadd.f32 %v1366_v7, %v1294_v9  ;;  %v1369_v17 = vmul.f32 %v2983_v34, %v3151_v23 }
 0x1ff   : > { %v1699_v1 = vpop.f32.mrf.mxu2  ;;  %v1788_v37 = vpop.f32.mrf.mxu3  ;;  %v1371_v41 = vmul.f32 %v2983_v34, %v3164_v44  ;;  %v3480_v57 = vunpack.c.l.bf16 %v2884_v53 }
 0x200   : > { %v1915_v5 = vadd.f32 %v1914_v30, %v1884_v33  ;;  %v1700_v10 = vadd.f32 %v3206_v26, %v1699_v1  ;;  %v1493_v11 = vmax.f32 %v1429_v31, 0.0  ;;  %v1494_v2 = vmax.f32 %v1430_v47, 0.0 }
 0x201   : > { %v1370_v33 = vmul.f32 %v2985_v38, %v3151_v23 }
 0x202   : > { %v1789_v0 = vadd.f32 %v1788_v37, %v1700_v10  ;;  %v1372_v37 = vmul.f32 %v2985_v38, %v3164_v44 }
 0x203   : > { %v1206_v29 = vpop.f32.mrf.mxu0  ;;  %v1295_v19 = vpop.f32.mrf.mxu1 }
 0x204   : > { %v1853_v55 = vsub.f32 %v1789_v0, %v3478_v4  ;;  %v1207_v15 = vadd.f32 %v1206_v29, %v2979_v18  ;;  %v1296_v51 = vadd.f32 %v1295_v19, %v2981_v27 }
 0x206   : > { %v1885_v36 = vand.u32 2147483647, %v1853_v55  ;;  %v1431_v54 = vadd.f32 %v1367_v62, %v1207_v15  ;;  %v1432_v6 = vadd.f32 %v1368_v42, %v1296_v51 }
 0x207   : > { %v1701_v39 = vpop.f32.mrf.mxu2  ;;  %v1790_v61 = vpop.f32.mrf.mxu3 }
 0x208   : > { %v1916_v59 = vadd.f32 %v1915_v5, %v1885_v36  ;;  %v1495_v50 = vmax.f32 %v1431_v54, 0.0  ;;  %v1496_v40 = vmax.f32 %v1432_v6, 0.0  ;;  %v1702_v46 = vadd.f32 %v3206_v26, %v1701_v39 }
 0x209   : > { %v3481_v54 = vunpack.c.h.bf16 %v2884_v53 }
 0x20a   : > { %v1791_v13 = vadd.f32 %v1790_v61, %v1702_v46  ;;  %v1529_v20 = vpack.c.bf16 %v1495_v50, %v1493_v11  ;;  %v1530_v49 = vpack.c.bf16 %v1496_v40, %v1494_v2  ;;  %v3482_v50 = vunpack.c.l.bf16 %v2922_v35 }
 0x20b   : > { %v1209_v30 = vpop.f32.mrf.mxu0  ;;  %v1298_v43 = vpop.f32.mrf.mxu1 }
 0x20c   : > { %v1854_v14 = vsub.f32 %v1791_v13, %v3479_v16  ;;  %1743 = vmatmul.bf16.gmra.mxu2 %v1529_v20  ;;  %1832 = vmatmul.bf16.gmra.mxu3 %v1530_v49  ;;  %v1210_v58 = vadd.f32 %v1209_v30, %v2979_v18  ;;  %v1299_v32 = vadd.f32 %v1298_v43, %v2981_v27  ;;  %v3483_v30 = vunpack.c.h.bf16 %v2922_v35 }
 0x20d   : > { %v3485_v35 = vunpack.c.h.bf16 %v2959_v28 }
 0x20e   : > { %v1886_v56 = vand.u32 2147483647, %v1854_v14  ;;  %v1433_v9 = vadd.f32 %v1369_v17, %v1210_v58  ;;  %v1434_v1 = vadd.f32 %v1370_v33, %v1299_v32 }
 0x20f   : > { %v1704_v3 = vpop.f32.mrf.mxu2  ;;  %v1793_v48 = vpop.f32.mrf.mxu3 }
 0x210   : > { %v1917_v52 = vadd.f32 %v1916_v59, %v1886_v56  ;;  %v1705_v8 = vadd.f32 %v3206_v26, %v1704_v3  ;;  %v1497_v29 = vmax.f32 %v1433_v9, 0.0  ;;  %v1498_v19 = vmax.f32 %v1434_v1, 0.0 }
 0x212   : > { %v1794_v24 = vadd.f32 %v1793_v48, %v1705_v8 }
 0x213   : > { %v1211_v5 = vpop.f32.mrf.mxu0  ;;  %v1300_v10 = vpop.f32.mrf.mxu1 }
 0x214   : > { %v1855_v7 = vsub.f32 %v1794_v24, %v3480_v57  ;;  %v1212_v0 = vadd.f32 %v1211_v5, %v2979_v18  ;;  %v1301_v62 = vadd.f32 %v1300_v10, %v2981_v27 }
 0x216   : > { %v1887_v31 = vand.u32 2147483647, %v1855_v7  ;;  %v1435_v23 = vadd.f32 %v1371_v41, %v1212_v0  ;;  %v1436_v47 = vadd.f32 %v1372_v37, %v1301_v62  ;;  %v3486_v62 = vunpack.c.l.bf16 %v2988_v45 }
 0x217   : > { %v1706_v34 = vpop.f32.mrf.mxu2  ;;  %v1795_v51 = vpop.f32.mrf.mxu3 }
 0x218   : > { %v1918_v42 = vadd.f32 %v1917_v52, %v1887_v31  ;;  %v1499_v4 = vmax.f32 %v1435_v23, 0.0  ;;  %v1500_v55 = vmax.f32 %v1436_v47, 0.0  ;;  %v1707_v15 = vadd.f32 %v3206_v26, %v1706_v34 }
 0x219   : > { %v3484_v52 = vunpack.c.l.bf16 %v2959_v28  ;;  %v3487_v28 = vunpack.c.h.bf16 %v2988_v45 }
 0x21a   : > { %v1796_v38 = vadd.f32 %v1795_v51, %v1707_v15  ;;  %v1531_v44 = vpack.c.bf16 %v1499_v4, %v1497_v29  ;;  %v1532_v36 = vpack.c.bf16 %v1500_v55, %v1498_v19 }
 0x21c   : > { %v1856_v18 = vsub.f32 %v1796_v38, %v3481_v54  ;;  %1748 = vmatmul.bf16.gmra.mxu2 %v1531_v44  ;;  %1837 = vmatmul.bf16.gmra.mxu3 %v1532_v36  ;;  %v3488_v54 = vunpack.c.l.bf16 %v3014_v22 }
 0x21e   : > { %v1888_v27 = vand.u32 2147483647, %v1856_v18 }
 0x21f   : > { %v1709_v6 = vpop.f32.mrf.mxu2  ;;  %v1798_v39 = vpop.f32.mrf.mxu3 }
 0x220   : > { %v1919_v11 = vadd.f32 %v1918_v42, %v1888_v27  ;;  %v1710_v2 = vadd.f32 %v3206_v26, %v1709_v6 }
 0x222   : > { %v1799_v59 = vadd.f32 %v1798_v39, %v1710_v2 }
 0x224   : > { %v1857_v40 = vsub.f32 %v1799_v59, %v3482_v50 }
 0x226   : > { %v1889_v46 = vand.u32 2147483647, %v1857_v40 }
 0x227   : > { %v1711_v61 = vpop.f32.mrf.mxu2  ;;  %v1800_v49 = vpop.f32.mrf.mxu3 }
 0x228   : > { %v1920_v13 = vadd.f32 %v1919_v11, %v1889_v46  ;;  %v1712_v20 = vadd.f32 %v3206_v26, %v1711_v61 }
 0x22a   : > { %v1801_v53 = vadd.f32 %v1800_v49, %v1712_v20 }
 0x22c   : > { %v1858_v43 = vsub.f32 %v1801_v53, %v3483_v30 }
 0x22e   : > { %v1890_v16 = vand.u32 2147483647, %v1858_v43 }
 0x22f   : > { %v1714_v14 = vpop.f32.mrf.mxu2  ;;  %v1803_v32 = vpop.f32.mrf.mxu3 }
 0x230   : > { %v1921_v56 = vadd.f32 %v1920_v13, %v1890_v16  ;;  %v1715_v58 = vadd.f32 %v3206_v26, %v1714_v14 }
 0x232   : > { %v1804_v3 = vadd.f32 %v1803_v32, %v1715_v58 }
 0x234   : > { %v1859_v8 = vsub.f32 %v1804_v3, %v3484_v52 }
 0x236   : > { %v1891_v48 = vand.u32 2147483647, %v1859_v8  ;;  %v3489_v8 = vunpack.c.h.bf16 %v3014_v22 }
 0x237   : > { %v1716_v17 = vpop.f32.mrf.mxu2  ;;  %v1805_v41 = vpop.f32.mrf.mxu3 }
 0x238   : > { %v1922_v33 = vadd.f32 %v1921_v56, %v1891_v48  ;;  %v1717_v24 = vadd.f32 %v3206_v26, %v1716_v17 }
 0x23a   : > { %v1806_v9 = vadd.f32 %v1805_v41, %v1717_v24  ;;  %v3490_v24 = vunpack.c.l.bf16 %v3045_v12 }
 0x23c   : > { %v1860_v1 = vsub.f32 %v1806_v9, %v3485_v35 }
 0x23e   : > { %v1892_v5 = vand.u32 2147483647, %v1860_v1 }
 0x23f   : > { %v1719_v10 = vpop.f32.mrf.mxu2  ;;  %v1808_v7 = vpop.f32.mrf.mxu3 }
 0x240   : > { %v1923_v37 = vadd.f32 %v1922_v33, %v1892_v5  ;;  %v1720_v57 = vadd.f32 %v3206_v26, %v1719_v10  ;;  %v3491_v5 = vunpack.c.h.bf16 %v3045_v12 }
 0x242   : > { %v1809_v0 = vadd.f32 %v1808_v7, %v1720_v57 }
 0x244   : > { %v1861_v31 = vsub.f32 %v1809_v0, %v3486_v62  ;;  %v3492_v62 = vunpack.c.l.bf16 %v3072_v63 }
 0x246   : > { %v1893_v23 = vand.u32 2147483647, %v1861_v31 }
 0x247   : > { %v1721_v47 = vpop.f32.mrf.mxu2  ;;  %v1810_v34 = vpop.f32.mrf.mxu3 }
 0x248   : > { %v1924_v29 = vadd.f32 %v1923_v37, %v1893_v23  ;;  %v1722_v19 = vadd.f32 %v3206_v26, %v1721_v47 }
 0x24a   : > { %v1811_v42 = vadd.f32 %v1810_v34, %v1722_v19  ;;  %v3493_v34 = vunpack.c.h.bf16 %v3072_v63 }
 0x24c   : > { %v1862_v4 = vsub.f32 %v1811_v42, %v3487_v28 }
 0x24e   : > { %v1894_v55 = vand.u32 2147483647, %v1862_v4 }
 0x24f   : > { %v1724_v15 = vpop.f32.mrf.mxu2  ;;  %v1813_v44 = vpop.f32.mrf.mxu3 }
 0x250   : > { %v1925_v51 = vadd.f32 %v1924_v29, %v1894_v55  ;;  %v1725_v38 = vadd.f32 %v3206_v26, %v1724_v15  ;;  %v3494_v15 = vunpack.c.l.bf16 %v3098_v60 }
 0x252   : > { %v1814_v36 = vadd.f32 %v1813_v44, %v1725_v38 }
 0x254   : > { %v1863_v18 = vsub.f32 %v1814_v36, %v3488_v54 }
 0x256   : > { %v1895_v27 = vand.u32 2147483647, %v1863_v18  ;;  %v3495_v18 = vunpack.c.h.bf16 %v3098_v60 }
 0x257   : > { %v1726_v6 = vpop.f32.mrf.mxu2  ;;  %v1815_v2 = vpop.f32.mrf.mxu3 }
 0x258   : > { %v1926_v11 = vadd.f32 %v1925_v51, %v1895_v27  ;;  %v1727_v43 = vadd.f32 %v3206_v26, %v1726_v6 }
 0x25a   : > { %v1816_v14 = vadd.f32 %v1815_v2, %v1727_v43 }
 0x25c   : > { %v1864_v48 = vsub.f32 %v1816_v14, %v3489_v8  ;;  %v3499_v8 = vunpack.c.h.bf16 %v3154_v25 }
 0x25e   : > { %v1896_v1 = vand.u32 2147483647, %v1864_v48 }
 0x25f   : > { %v1729_v39 = vpop.f32.mrf.mxu2  ;;  %v1818_v59 = vpop.f32.mrf.mxu3 }
 0x260   : > { %v1730_v16 = vadd.f32 %v3206_v26, %v1729_v39  ;;  %v1927_v29 = vadd.f32 %v1926_v11, %v1896_v1 }
 0x262   : > { %v1819_v3 = vadd.f32 %v1818_v59, %v1730_v16  ;;  %v3496_v59 = vld [vmem:[#allocation5_spill] sm:$0xff] }
 0x264   : > { %v1865_v41 = vsub.f32 %v1819_v3, %v3490_v24 }
 0x266   : > { %v1897_v22 = vand.u32 2147483647, %v1865_v41 }
 0x267   : > { %v1731_v50 = vpop.f32.mrf.mxu2  ;;  %v1820_v40 = vpop.f32.mrf.mxu3 }
 0x268   : > { %v1732_v56 = vadd.f32 %v3206_v26, %v1731_v50  ;;  %v1928_v4 = vadd.f32 %v1927_v29, %v1897_v22  ;;  %v3497_v50 = vunpack.c.l.bf16 %v3496_v59 }
 0x26a   : > { %v1821_v17 = vadd.f32 %v1820_v40, %v1732_v56 }
 0x26c   : > { %v1866_v10 = vsub.f32 %v1821_v17, %v3491_v5 }
 0x26e   : > { %v1898_v19 = vand.u32 2147483647, %v1866_v10 }
 0x26f   : > { %v1734_v45 = vpop.f32.mrf.mxu2  ;;  %v1823_v46 = vpop.f32.mrf.mxu3 }
 0x270   : > { %v1735_v52 = vadd.f32 %v3206_v26, %v1734_v45  ;;  %v1929_v44 = vadd.f32 %v1928_v4, %v1898_v19 }
 0x272   : > { %v1824_v9 = vadd.f32 %v1823_v46, %v1735_v52 }
 0x274   : > { %v1867_v31 = vsub.f32 %v1824_v9, %v3492_v62 }
 0x276   : > { %v1899_v55 = vand.u32 2147483647, %v1867_v31 }
 0x277   : > { %v1736_v61 = vpop.f32.mrf.mxu2  ;;  %v1825_v13 = vpop.f32.mrf.mxu3 }
 0x278   : > { %v1737_v33 = vadd.f32 %v3206_v26, %v1736_v61  ;;  %v1930_v2 = vadd.f32 %v1929_v44, %v1899_v55 }
 0x27a   : > { %v1826_v57 = vadd.f32 %v1825_v13, %v1737_v33  ;;  %v3498_v13 = vunpack.c.h.bf16 %v3496_v59 }
 0x27c   : > { %v1868_v42 = vsub.f32 %v1826_v57, %v3493_v34 }
 0x27e   : > { %v1900_v54 = vand.u32 2147483647, %v1868_v42 }
 0x27f   : > { %v1739_v20 = vpop.f32.mrf.mxu2  ;;  %v1828_v49 = vpop.f32.mrf.mxu3 }
 0x280   : > { %v1740_v35 = vadd.f32 %v3206_v26, %v1739_v20  ;;  %v1931_v46 = vadd.f32 %v1930_v2, %v1900_v54 }
 0x282   : > { %v1829_v23 = vadd.f32 %v1828_v49, %v1740_v35 }
 0x284   : > { %v1869_v51 = vsub.f32 %v1829_v23, %v3494_v15 }
 0x286   : > { %v1901_v39 = vand.u32 2147483647, %v1869_v51 }
 0x287   : > { %v1741_v53 = vpop.f32.mrf.mxu2  ;;  %v1830_v30 = vpop.f32.mrf.mxu3 }
 0x288   : > { %v1742_v7 = vadd.f32 %v3206_v26, %v1741_v53  ;;  %v1932_v49 = vadd.f32 %v1931_v46, %v1901_v39 }
 0x28a   : > { %v1831_v28 = vadd.f32 %v1830_v30, %v1742_v7 }
 0x28c   : > { %v1870_v27 = vsub.f32 %v1831_v28, %v3495_v18 }
 0x28e   : > { %v1902_v61 = vand.u32 2147483647, %v1870_v27 }
 0x28f   : > { %v1744_v58 = vpop.f32.mrf.mxu2  ;;  %v1833_v32 = vpop.f32.mrf.mxu3 }
 0x290   : > { %v1745_v47 = vadd.f32 %v3206_v26, %v1744_v58  ;;  %v1933_v43 = vadd.f32 %v1932_v49, %v1902_v61 }
 0x292   : > { %v1834_v38 = vadd.f32 %v1833_v32, %v1745_v47 }
 0x294   : > { %v1871_v40 = vsub.f32 %v1834_v38, %v3497_v50 }
 0x296   : > { %v1903_v60 = vand.u32 2147483647, %v1871_v40 }
 0x297   : > { %v1746_v37 = vpop.f32.mrf.mxu2  ;;  %v1835_v0 = vpop.f32.mrf.mxu3 }
 0x298   : > { %v1747_v12 = vadd.f32 %v3206_v26, %v1746_v37  ;;  %v1934_v58 = vadd.f32 %v1933_v43, %v1903_v60 }
 0x29a   : > { %v1836_v6 = vadd.f32 %v1835_v0, %v1747_v12 }
 0x29c   : > { %v1872_v20 = vsub.f32 %v1836_v6, %v3498_v13 }
 0x29e   : > { %v1904_v16 = vand.u32 2147483647, %v1872_v20 }
 0x29f   : > { %v1749_v36 = vpop.f32.mrf.mxu2  ;;  %v1838_v11 = vpop.f32.mrf.mxu3 }
 0x2a0   : > { %v1750_v63 = vadd.f32 %v3206_v26, %v1749_v36  ;;  %v1935_v52 = vadd.f32 %v1934_v58, %v1904_v16 }
 0x2a2   : > { %v1839_v45 = vadd.f32 %v1838_v11, %v1750_v63 }
 0x2a4   : > { %v1873_v53 = vsub.f32 %v1839_v45, %v2353_v21 }
 0x2a6   : > { %v1905_v32 = vand.u32 2147483647, %v1873_v53 }
 0x2a7   : > { %v1751_v30 = vpop.f32.mrf.mxu2  ;;  %v1840_v56 = vpop.f32.mrf.mxu3 }
 0x2a8   : > { %v1752_v14 = vadd.f32 %v3206_v26, %v1751_v30  ;;  %v1936_v48 = vadd.f32 %v1935_v52, %v1905_v32 }
 0x2aa   : > { %v1841_v3 = vadd.f32 %v1840_v56, %v1752_v14 }
 0x2ac   : > { %v1874_v21 = vsub.f32 %v1841_v3, %v3499_v8 }
 0x2ae   : > { %v1906_v17 = vand.u32 2147483647, %v1874_v21 }
 0x2b0   : > { %v1937_v33 = vadd.f32 %v1936_v48, %v1906_v17 }
 0x2b2   : > { %1938 = vst [vmem:[%s374_s26] sm:$0xff] %v1937_v33 }
 0x2b3   : > { %2456 = shalt.err (!%p2453_p3)
}
 0x2b4   : > { %2385 = dma.vmem_to_hbm [thread:$0]  (%p2582_p5), %s1953_s27, 128, %s1955_s13, %s1940_s21  }
 0x2b5 PF: > { %p2391_p4 = scmp.ge.s32.totalorder %s2491_s12, 2  ;;  %s1966_s14 = sand.u32 1, %s2479_s30  }
 0x2b6   : > { %s1967_s23 = scalar_lea.sflag [#allocation3], %s1966_s14 }
 0x2b7   : > { %p2388_p7 = pnand %p2391_p4, %p2586_p6 }
 0x2b9   : > { %p2389_p8 = pneg %p2388_p7 }
 0x2bb   : > { %2474 = dma.done.wait (%p2389_p8), %s1967_s23, 128  }
 0x2bc   : > { %2476 = vsyncadd (%p2389_p8), %s1967_s23, 4294967168  ;;  %p19_p9 = scmp.ge.s32.totalorder %s2569_s15, 4   ;;  %s3500_s30 = smov %s2483_s10 }
 0x2bd   : > { %s3501_s10 = smov %s2487_s11  ;;  %s3502_s11 = smov %s2580_s18 }
 0x2be   : > { %s3503_s12 = smov %s2569_s15  ;;  %21 = sbr.rel (!%p19_p9) target bundleno = 5 (0x5), region = 100 }
 0x2c3   :  { %1973 = vsyncpa [#allocation3], 1 }
 0x2c4   :  { %1975 = vsyncpa [#allocation3 + $0x1], 1 }

</bundles_post_ra>
